<compile_context>
chip_gen: v5e
topology: v5e:2x2
jax: 0.10.0
libtpu: 0.0.40
codegen_flags: <defaults>
</compile_context>

<pallas_src>
import functools

import jax
import jax.numpy as jnp
from jax.experimental import pallas as pl
from jax.experimental.pallas import tpu as pltpu


HIDDEN = 32          # hidden_layer_size
SUB = 512            # lane sub-chunk: (32, 512) f32 intermediate = 16 vregs
MAX_TL = 2048        # <= 4 sub-chunks per grid step
TARGET_STEPS = 16    # aim for enough grid steps for v7x megacore + pipelining


def _zeta_kernel(k_ref, w0_ref, b0_ref, w1_ref, b1_ref,
                 w2_ref, b2_ref, w3_ref, b3_ref, o_ref, *, nsub, sub):
    # k_ref: (3, TL) -- batch on the lane axis.  Weights are grid-constant VMEM
    # blocks; b3 is an SMEM scalar.
    w0 = w0_ref[...]          # (H, 3)
    b0 = b0_ref[...]          # (H, 1)
    w1 = w1_ref[...]          # (H, H)
    b1 = b1_ref[...]          # (H, 1)
    w2 = w2_ref[...]          # (H, H)
    b2 = b2_ref[...]          # (H, 1)
    w3 = w3_ref[...]          # (H, 1)
    b3 = b3_ref[0, 0]         # scalar

    # Independent lane sub-chunks: bounds live ranges and lets the scheduler
    # overlap VPU/EUP work of one chunk under the MXU matmuls of another.
    for c in range(nsub):
        cols = slice(c * sub, (c + 1) * sub)
        x = k_ref[:, cols]                                          # (3, SUB)

        # |k|^2 per column (pure VPU) and its reciprocal, hoisted before the
        # matmuls so the divide latency hides under MXU work.
        kk = (x[0:1, :] * x[0:1, :]
              + x[1:2, :] * x[1:2, :]
              + x[2:3, :] * x[2:3, :])                              # (1, SUB)
        inv_kk = 1.0 / kk

        # fc0 (3 -> H) as three broadcast FMAs on the VPU.
        h = (w0[:, 0:1] * x[0:1, :]
             + w0[:, 1:2] * x[1:2, :]
             + w0[:, 2:3] * x[2:3, :]
             + b0)                                                  # (H, SUB)
        h = jnp.maximum(h, 0.0)

        # fc1 + ReLU (MXU). Precision pinned: exact f32 (bf16 would break 1e-5 tol).
        h = jnp.dot(w1, h, preferred_element_type=jnp.float32,
                    precision=jax.lax.Precision.HIGHEST) + b1
        h = jnp.maximum(h, 0.0)

        # fc2 + ReLU (MXU).
        h = jnp.dot(w2, h, preferred_element_type=jnp.float32,
                    precision=jax.lax.Precision.HIGHEST) + b2
        h = jnp.maximum(h, 0.0)

        # fc3 (H -> 1) as a sublane reduce (XLU); b3 scalar from SMEM.
        out = jnp.sum(w3 * h, axis=0, keepdims=True) + b3           # (1, SUB)

        # Lane-dense (1, SUB) store, SUB multiple of 128 -> unmasked vst.
        o_ref[:, cols] = out * inv_kk


def _pick_tile(n):
    """Lanes per grid step: multiple of SUB, 512..2048, aiming for ~16 steps."""
    per_step = -(-n // TARGET_STEPS)             # ceil(n / TARGET_STEPS)
    tl = -(-per_step // SUB) * SUB               # round up to multiple of SUB
    return max(SUB, min(MAX_TL, tl))


@jax.jit
def zeta_net_forward(k, params):
    """k: array of shape [..., 3]; params: dict in torch Linear layout."""
    lead_shape = k.shape[:-1]
    k_flat = k.reshape(-1, 3).astype(jnp.float32)
    n = k_flat.shape[0]

    tl = _pick_tile(n)
    nsub = tl // SUB

    # Transposed, lane-dense input: (3, N).  Pad columns up to a multiple of TL
    # with k = 1 so padded columns have kk = 3 (no inf/nan).  XLA fuses the
    # transpose and pad into a single layout copy.
    k_t = k_flat.T
    n_pad = (-n) % tl
    if n_pad:
        k_t = jnp.pad(k_t, ((0, 0), (0, n_pad)), constant_values=1.0)
    n_total = n + n_pad
    grid = (n_total // tl,)

    f32 = jnp.float32
    w0 = params["w0"].astype(f32)                          # (H, 3)
    b0 = params["b0"].astype(f32).reshape(HIDDEN, 1)       # (H, 1)
    w1 = params["w1"].astype(f32)                          # (H, H)
    b1 = params["b1"].astype(f32).reshape(HIDDEN, 1)
    w2 = params["w2"].astype(f32)                          # (H, H)
    b2 = params["b2"].astype(f32).reshape(HIDDEN, 1)
    w3 = params["w3"].astype(f32).reshape(HIDDEN, 1)       # column form for fc3 reduce
    b3 = params["b3"].astype(f32).reshape(1, 1)            # SMEM scalar

    full = lambda shape: pl.BlockSpec(shape, lambda i: (0, 0))

    flops = 2 * n_total * (3 * HIDDEN + 2 * HIDDEN * HIDDEN + HIDDEN) + 10 * n_total
    bytes_accessed = 4 * n_total * (3 + 1) + 4 * (3 * HIDDEN + 2 * HIDDEN * HIDDEN + HIDDEN + 3 * HIDDEN + 1)

    kernel = functools.partial(_zeta_kernel, nsub=nsub, sub=SUB)

    out = pl.pallas_call(
        kernel,
        out_shape=jax.ShapeDtypeStruct((1, n_total), jnp.float32),
        grid_spec=pltpu.PrefetchScalarGridSpec(
            num_scalar_prefetch=0,
            grid=grid,
            in_specs=[
                pl.BlockSpec((3, tl), lambda i: (0, i)),     # k tile (3, TL)
                full((HIDDEN, 3)),                           # w0
                full((HIDDEN, 1)),                           # b0
                full((HIDDEN, HIDDEN)),                      # w1
                full((HIDDEN, 1)),                           # b1
                full((HIDDEN, HIDDEN)),                      # w2
                full((HIDDEN, 1)),                           # b2
                full((HIDDEN, 1)),                           # w3 (column)
                pl.BlockSpec(memory_space=pltpu.MemorySpace.SMEM),  # b3 scalar
            ],
            out_specs=pl.BlockSpec((1, tl), lambda i: (0, i)),
        ),
        compiler_params=pltpu.CompilerParams(
            dimension_semantics=("parallel",)),
        cost_estimate=pl.CostEstimate(
            flops=int(flops), transcendentals=0,
            bytes_accessed=int(bytes_accessed)),
    )(k_t, w0, b0, w1, b1, w2, b2, w3, b3)

    return out[0, :n].reshape(lead_shape)


def init_params(key, hidden=HIDDEN):
    """Deterministic init mimicking torch.nn.Linear default (uniform +-1/sqrt(fan_in)).

    Weights are stored in torch layout: (out_features, in_features); biases 1-D.
    """
    ks = jax.random.split(key, 8)

    def lin(kw, kb, fan_in, fan_out):
        bound = 1.0 / jnp.sqrt(float(fan_in))
        w = jax.random.uniform(kw, (fan_out, fan_in), jnp.float32, -bound, bound)
        b = jax.random.uniform(kb, (fan_out,), jnp.float32, -bound, bound)
        return w, b

    w0, b0 = lin(ks[0], ks[1], 3, hidden)
    w1, b1 = lin(ks[2], ks[3], hidden, hidden)
    w2, b2 = lin(ks[4], ks[5], hidden, hidden)
    w3, b3 = lin(ks[6], ks[7], hidden, 1)
    return dict(w0=w0, b0=b0, w1=w1, b1=b1, w2=w2, b2=b2, w3=w3, b3=b3)


def zeta_net_reference(k, params):
    """Plain-JAX reference for correctness check (torch-layout weights)."""
    k = k.astype(jnp.float32)
    kk = jnp.sum(k * k, axis=-1)
    h = jnp.maximum(k @ params["w0"].T + params["b0"], 0.0)
    h = jnp.maximum(h @ params["w1"].T + params["b1"], 0.0)
    h = jnp.maximum(h @ params["w2"].T + params["b2"], 0.0)
    out = h @ params["w3"].T + params["b3"]
    return out[..., 0] / kk


if __name__ == "__main__":
    key = jax.random.PRNGKey(0)
    k_param, k_input = jax.random.split(key)

    params = init_params(k_param)

    # small input: batch of wavevectors, shape (2, 8, 8, 3) -> 128 rows
    k = jax.random.normal(k_input, (2, 8, 8, 3), jnp.float32) + 0.5

    out = zeta_net_forward(k, params)
    out = jax.block_until_ready(out)

    ref = zeta_net_reference(k, params)
    assert out.shape == k.shape[:-1], (out.shape, k.shape[:-1])
    assert jnp.allclose(out, ref, rtol=1e-5, atol=1e-5), "mismatch vs reference"

    print("KERNEL_OK")
</pallas_src>

<mosaic_0001>
module attributes {stable_mosaic.version = 11 : i64} {
  func.func @_zeta_kernel(%arg0: i32, %arg1: memref<3x512xf32, #tpu.memory_space<vmem>>, %arg2: memref<32x3xf32, #tpu.memory_space<vmem>>, %arg3: memref<32x1xf32, #tpu.memory_space<vmem>>, %arg4: memref<32x32xf32, #tpu.memory_space<vmem>>, %arg5: memref<32x1xf32, #tpu.memory_space<vmem>>, %arg6: memref<32x32xf32, #tpu.memory_space<vmem>>, %arg7: memref<32x1xf32, #tpu.memory_space<vmem>>, %arg8: memref<32x1xf32, #tpu.memory_space<vmem>>, %arg9: memref<1x1xf32, #tpu.memory_space<smem>>, %arg10: memref<1x512xf32, #tpu.memory_space<vmem>>) attributes {dimension_semantics = [#tpu.dimension_semantics<parallel>], iteration_bounds = array<i64: 1>, scalar_prefetch = 0 : i64, scratch_operands = 0 : i64, tpu.core_type = #tpu.core_type<tc>, window_params = [{transform_indices = @transform_0, window_bounds = array<i64: 3, 512>}, {pipeline_mode = #tpu.pipeline_mode<synchronous>, transform_indices = @transform_1, window_bounds = array<i64: 32, 3>}, {pipeline_mode = #tpu.pipeline_mode<synchronous>, transform_indices = @transform_2, window_bounds = array<i64: 32, 1>}, {pipeline_mode = #tpu.pipeline_mode<synchronous>, transform_indices = @transform_3, window_bounds = array<i64: 32, 32>}, {pipeline_mode = #tpu.pipeline_mode<synchronous>, transform_indices = @transform_4, window_bounds = array<i64: 32, 1>}, {pipeline_mode = #tpu.pipeline_mode<synchronous>, transform_indices = @transform_5, window_bounds = array<i64: 32, 32>}, {pipeline_mode = #tpu.pipeline_mode<synchronous>, transform_indices = @transform_6, window_bounds = array<i64: 32, 1>}, {pipeline_mode = #tpu.pipeline_mode<synchronous>, transform_indices = @transform_7, window_bounds = array<i64: 32, 1>}, {transform_indices = @transform_8, window_bounds = array<i64: 1, 1>}, {transform_indices = @transform_9, window_bounds = array<i64: 1, 512>}]} {
    %c0 = arith.constant 0 : index
    %c0_0 = arith.constant 0 : index
    %0 = vector.load %arg2[%c0, %c0_0] : memref<32x3xf32, #tpu.memory_space<vmem>>, vector<32x3xf32>
    %c0_1 = arith.constant 0 : index
    %c0_2 = arith.constant 0 : index
    %1 = vector.load %arg3[%c0_1, %c0_2] : memref<32x1xf32, #tpu.memory_space<vmem>>, vector<32x1xf32>
    %c0_3 = arith.constant 0 : index
    %c0_4 = arith.constant 0 : index
    %2 = vector.load %arg4[%c0_3, %c0_4] : memref<32x32xf32, #tpu.memory_space<vmem>>, vector<32x32xf32>
    %c0_5 = arith.constant 0 : index
    %c0_6 = arith.constant 0 : index
    %3 = vector.load %arg5[%c0_5, %c0_6] : memref<32x1xf32, #tpu.memory_space<vmem>>, vector<32x1xf32>
    %c0_7 = arith.constant 0 : index
    %c0_8 = arith.constant 0 : index
    %4 = vector.load %arg6[%c0_7, %c0_8] : memref<32x32xf32, #tpu.memory_space<vmem>>, vector<32x32xf32>
    %c0_9 = arith.constant 0 : index
    %c0_10 = arith.constant 0 : index
    %5 = vector.load %arg7[%c0_9, %c0_10] : memref<32x1xf32, #tpu.memory_space<vmem>>, vector<32x1xf32>
    %c0_11 = arith.constant 0 : index
    %c0_12 = arith.constant 0 : index
    %6 = vector.load %arg8[%c0_11, %c0_12] : memref<32x1xf32, #tpu.memory_space<vmem>>, vector<32x1xf32>
    %c0_13 = arith.constant 0 : index
    %c0_14 = arith.constant 0 : index
    %7 = memref.load %arg9[%c0_13, %c0_14] : memref<1x1xf32, #tpu.memory_space<smem>>
    %c0_15 = arith.constant 0 : index
    %c0_16 = arith.constant 0 : index
    %8 = vector.load %arg1[%c0_15, %c0_16] : memref<3x512xf32, #tpu.memory_space<vmem>>, vector<3x512xf32>
    %9 = vector.extract_strided_slice %8 {offsets = [0, 0], sizes = [1, 512], strides = [1, 1]} : vector<3x512xf32> to vector<1x512xf32>
    %10 = vector.extract_strided_slice %8 {offsets = [0, 0], sizes = [1, 512], strides = [1, 1]} : vector<3x512xf32> to vector<1x512xf32>
    %11 = arith.mulf %9, %10 : vector<1x512xf32>
    %12 = vector.extract_strided_slice %8 {offsets = [1, 0], sizes = [1, 512], strides = [1, 1]} : vector<3x512xf32> to vector<1x512xf32>
    %13 = vector.extract_strided_slice %8 {offsets = [1, 0], sizes = [1, 512], strides = [1, 1]} : vector<3x512xf32> to vector<1x512xf32>
    %14 = arith.mulf %12, %13 : vector<1x512xf32>
    %15 = arith.addf %11, %14 : vector<1x512xf32>
    %16 = vector.extract_strided_slice %8 {offsets = [2, 0], sizes = [1, 512], strides = [1, 1]} : vector<3x512xf32> to vector<1x512xf32>
    %17 = vector.extract_strided_slice %8 {offsets = [2, 0], sizes = [1, 512], strides = [1, 1]} : vector<3x512xf32> to vector<1x512xf32>
    %18 = arith.mulf %16, %17 : vector<1x512xf32>
    %19 = arith.addf %15, %18 : vector<1x512xf32>
    %cst = arith.constant 1.000000e+00 : f32
    %20 = vector.broadcast %cst : f32 to vector<1x512xf32>
    %21 = arith.divf %20, %19 : vector<1x512xf32>
    %22 = vector.extract_strided_slice %0 {offsets = [0, 0], sizes = [32, 1], strides = [1, 1]} : vector<32x3xf32> to vector<32x1xf32>
    %23 = vector.extract_strided_slice %8 {offsets = [0, 0], sizes = [1, 512], strides = [1, 1]} : vector<3x512xf32> to vector<1x512xf32>
    %24 = vector.broadcast %22 : vector<32x1xf32> to vector<32x512xf32>
    %25 = vector.broadcast %23 : vector<1x512xf32> to vector<32x512xf32>
    %26 = arith.mulf %24, %25 : vector<32x512xf32>
    %27 = vector.extract_strided_slice %0 {offsets = [0, 1], sizes = [32, 1], strides = [1, 1]} : vector<32x3xf32> to vector<32x1xf32>
    %28 = vector.extract_strided_slice %8 {offsets = [1, 0], sizes = [1, 512], strides = [1, 1]} : vector<3x512xf32> to vector<1x512xf32>
    %29 = vector.broadcast %27 : vector<32x1xf32> to vector<32x512xf32>
    %30 = vector.broadcast %28 : vector<1x512xf32> to vector<32x512xf32>
    %31 = arith.mulf %29, %30 : vector<32x512xf32>
    %32 = arith.addf %26, %31 : vector<32x512xf32>
    %33 = vector.extract_strided_slice %0 {offsets = [0, 2], sizes = [32, 1], strides = [1, 1]} : vector<32x3xf32> to vector<32x1xf32>
    %34 = vector.extract_strided_slice %8 {offsets = [2, 0], sizes = [1, 512], strides = [1, 1]} : vector<3x512xf32> to vector<1x512xf32>
    %35 = vector.broadcast %33 : vector<32x1xf32> to vector<32x512xf32>
    %36 = vector.broadcast %34 : vector<1x512xf32> to vector<32x512xf32>
    %37 = arith.mulf %35, %36 : vector<32x512xf32>
    %38 = arith.addf %32, %37 : vector<32x512xf32>
    %39 = vector.broadcast %1 : vector<32x1xf32> to vector<32x512xf32>
    %40 = arith.addf %38, %39 : vector<32x512xf32>
    %cst_17 = arith.constant 0.000000e+00 : f32
    %41 = vector.broadcast %cst_17 : f32 to vector<32x512xf32>
    %42 = arith.maximumf %40, %41 : vector<32x512xf32>
    %cst_18 = arith.constant dense<0.000000e+00> : vector<32x512xf32>
    %43 = tpu.matmul %2, %42, %cst_18 {dimension_numbers = #tpu.dot_dimension_numbers<[1], [0], [0], [1], [0, 0, 1, 1], [], []>, precision = #tpu.contract_precision<fp32>} : vector<32x32xf32>, vector<32x512xf32>, vector<32x512xf32> -> vector<32x512xf32>
    %44 = vector.broadcast %3 : vector<32x1xf32> to vector<32x512xf32>
    %45 = arith.addf %43, %44 : vector<32x512xf32>
    %cst_19 = arith.constant 0.000000e+00 : f32
    %46 = vector.broadcast %cst_19 : f32 to vector<32x512xf32>
    %47 = arith.maximumf %45, %46 : vector<32x512xf32>
    %cst_20 = arith.constant dense<0.000000e+00> : vector<32x512xf32>
    %48 = tpu.matmul %4, %47, %cst_20 {dimension_numbers = #tpu.dot_dimension_numbers<[1], [0], [0], [1], [0, 0, 1, 1], [], []>, precision = #tpu.contract_precision<fp32>} : vector<32x32xf32>, vector<32x512xf32>, vector<32x512xf32> -> vector<32x512xf32>
    %49 = vector.broadcast %5 : vector<32x1xf32> to vector<32x512xf32>
    %50 = arith.addf %48, %49 : vector<32x512xf32>
    %cst_21 = arith.constant 0.000000e+00 : f32
    %51 = vector.broadcast %cst_21 : f32 to vector<32x512xf32>
    %52 = arith.maximumf %50, %51 : vector<32x512xf32>
    %53 = vector.broadcast %6 : vector<32x1xf32> to vector<32x512xf32>
    %54 = arith.mulf %53, %52 : vector<32x512xf32>
    %cst_22 = arith.constant dense<0.000000e+00> : vector<512xf32>
    %55 = vector.multi_reduction <add>, %54, %cst_22 [0] : vector<32x512xf32> to vector<512xf32>
    %56 = vector.shape_cast %55 : vector<512xf32> to vector<1x512xf32>
    %57 = vector.broadcast %7 : f32 to vector<1x512xf32>
    %58 = arith.addf %56, %57 : vector<1x512xf32>
    %59 = arith.mulf %58, %21 : vector<1x512xf32>
    %c0_23 = arith.constant 0 : index
    %c0_24 = arith.constant 0 : index
    %60 = vector.load %arg10[%c0_23, %c0_24] : memref<1x512xf32, #tpu.memory_space<vmem>>, vector<1x512xf32>
    tpu.vector_store %arg10[%c0_23, %c0_24], %59 {strides = array<i32>} : memref<1x512xf32, #tpu.memory_space<vmem>>, vector<1x512xf32>,
    return
  }
  func.func @transform_0(%arg0: i32) -> (i32, i32) {
    %c0_i32 = arith.constant 0 : i32
    %c0_i32_0 = arith.constant 0 : i32
    return %c0_i32, %arg0 : i32, i32
  }
  func.func @transform_1(%arg0: i32) -> (i32, i32) {
    %c0_i32 = arith.constant 0 : i32
    %c0_i32_0 = arith.constant 0 : i32
    %c0_i32_1 = arith.constant 0 : i32
    return %c0_i32, %c0_i32_0 : i32, i32
  }
  func.func @transform_2(%arg0: i32) -> (i32, i32) {
    %c0_i32 = arith.constant 0 : i32
    %c0_i32_0 = arith.constant 0 : i32
    %c0_i32_1 = arith.constant 0 : i32
    return %c0_i32, %c0_i32_0 : i32, i32
  }
  func.func @transform_3(%arg0: i32) -> (i32, i32) {
    %c0_i32 = arith.constant 0 : i32
    %c0_i32_0 = arith.constant 0 : i32
    %c0_i32_1 = arith.constant 0 : i32
    return %c0_i32, %c0_i32_0 : i32, i32
  }
  func.func @transform_4(%arg0: i32) -> (i32, i32) {
    %c0_i32 = arith.constant 0 : i32
    %c0_i32_0 = arith.constant 0 : i32
    %c0_i32_1 = arith.constant 0 : i32
    return %c0_i32, %c0_i32_0 : i32, i32
  }
  func.func @transform_5(%arg0: i32) -> (i32, i32) {
    %c0_i32 = arith.constant 0 : i32
    %c0_i32_0 = arith.constant 0 : i32
    %c0_i32_1 = arith.constant 0 : i32
    return %c0_i32, %c0_i32_0 : i32, i32
  }
  func.func @transform_6(%arg0: i32) -> (i32, i32) {
    %c0_i32 = arith.constant 0 : i32
    %c0_i32_0 = arith.constant 0 : i32
    %c0_i32_1 = arith.constant 0 : i32
    return %c0_i32, %c0_i32_0 : i32, i32
  }
  func.func @transform_7(%arg0: i32) -> (i32, i32) {
    %c0_i32 = arith.constant 0 : i32
    %c0_i32_0 = arith.constant 0 : i32
    %c0_i32_1 = arith.constant 0 : i32
    return %c0_i32, %c0_i32_0 : i32, i32
  }
  func.func @transform_8(%arg0: i32) -> (i32, i32) {
    %c0_i32 = arith.constant 0 : i32
    %c0_i32_0 = arith.constant 0 : i32
    %c0_i32_1 = arith.constant 0 : i32
    return %c0_i32, %c0_i32_0 : i32, i32
  }
  func.func @transform_9(%arg0: i32) -> (i32, i32) {
    %c0_i32 = arith.constant 0 : i32
    %c0_i32_0 = arith.constant 0 : i32
    return %c0_i32, %arg0 : i32, i32
  }
}

</mosaic_0001>

<bundles_post_ra>
// kernel: squeeze.1
= control target key start
LH: loop header
LB: loop body
LE: loop exit
PB: predicated region body
PF: predicated region fallthrough
CT: control target
= control target key end

     0   :  { %s202_s0 = inlined_call_operand.vmem [shape: f32[128], index: 0, kind: input, shape index: {}]   ;;  %s203_s1 = inlined_call_operand.hbm [shape: f32[2,8,8], index: 1, kind: output, shape index: {}]  }
   0x1   :  { %v5_v0 = vld [vmem:[%s202_s0] sm:$0x1] }
   0x2   :  { %2 = vsyncpa [#allocation1], 0  ;;  %6 = vst [vmem:[#allocation2] sm:$0x1] %v5_v0  ;;  %s154_s0 = smov 104   ;;  %s155_s8 = smov 120  }
   0x3   :  { %s156_s9 = smov 88   ;;  %s157_s10 = smov 96   ;;  %vm8_vm0 = vcmask 64512  }
   0x4   :  { %s158_s11 = smov 112   ;;  %s159_s12 = smov 80  }
   0x5   :  { %s160_s13 = smov 64   ;;  %s161_s14 = smov 72  }
   0x6   :  { %s162_s15 = smov 56   ;;  %s163_s16 = smov 40  }
   0x7   :  { %s164_s17 = smov 48   ;;  %s165_s18 = smov 32  }
   0x8   :  { %s166_s19 = smov 16   ;;  %s167_s20 = smov 24  }
   0x9   :  { %v22_v1 = vld [vmem:[#allocation2] sm:$0x1]   ;;  %s168_s21 = smov 8   ;;  %s169_s22 = smov [#allocation0]  }
   0xa   :  { %v10_v2 = vld [vmem:[#allocation2] sm:$0x1]   ;;  %23 = vrot.lane.b32.xlu1 %v22_v1, %s154_s0  ;;  %s103_s23 = sshll.u32 %s169_s22, 4  ;;  %s105_s1 = sshll.u32 %s203_s1, 4  ;;  %s104_s23 = int_to_ptr.vmem [resolvable:$true] %s103_s23  ;;  %s106_s1 = int_to_ptr.hbm [resolvable:$true] %s105_s1 }
   0xb   :  { %11 = vrot.lane.b32.xlu0 %v10_v2, %s155_s8  ;;  %v34_v3 = vld [vmem:[#allocation2] sm:$0x1]  }
   0xc   :  { %35 = vrot.lane.b32.xlu2 %v34_v3, %s156_s9  ;;  %v28_v4 = vld [vmem:[#allocation2] sm:$0x1]  }
   0xd   :  { %v16_v5 = vld [vmem:[#allocation2] sm:$0x1]  }
   0xe   :  { %v40_v6 = vld [vmem:[#allocation2] sm:$0x1]  }
   0xf   :  { %v52_v7 = vld [vmem:[#allocation2] sm:$0x1]  }
  0x10   :  { %v46_v8 = vld [vmem:[#allocation2] sm:$0x1]  }
  0x11   :  { %v58_v9 = vld [vmem:[#allocation2] sm:$0x1]  }
  0x12   :  { %29 = vrot.lane.b32.xlu1 %v28_v4, %s157_s10  ;;  %v70_v10 = vld [vmem:[#allocation2] sm:$0x1]  }
  0x13   :  { %17 = vrot.lane.b32.xlu0 %v16_v5, %s158_s11  ;;  %v64_v11 = vld [vmem:[#allocation2] sm:$0x1]  }
  0x14   :  { %41 = vrot.lane.b32.xlu2 %v40_v6, %s159_s12  ;;  %v76_v12 = vld [vmem:[#allocation2] sm:$0x1]  }
  0x15   :  { %v88_v13 = vld [vmem:[#allocation2] sm:$0x1]  }
  0x16   :  { %v82_v14 = vld [vmem:[#allocation2] sm:$0x1]  }
  0x17   :  { %v94_v15 = vld [vmem:[#allocation2] sm:$0x1]  }
  0x18   :  { %v7_v21 = vld [vmem:[#allocation2] sm:$0x1]  }
  0x19   :  { %9 = vst.msk [vmem:[#allocation0] sm:$0x1] %vm8_vm0, %v7_v21  }
  0x1a   :  { %53 = vrot.lane.b32.xlu1 %v52_v7, %s160_s13 }
  0x1b   :  { %47 = vrot.lane.b32.xlu0 %v46_v8, %s161_s14 }
  0x1c   :  { %59 = vrot.lane.b32.xlu2 %v58_v9, %s162_s15 }
  0x22   :  { %71 = vrot.lane.b32.xlu1 %v70_v10, %s163_s16 }
  0x23   :  { %65 = vrot.lane.b32.xlu0 %v64_v11, %s164_s17 }
  0x24   :  { %77 = vrot.lane.b32.xlu2 %v76_v12, %s165_s18 }
  0x2a   :  { %89 = vrot.lane.b32.xlu1 %v88_v13, %s166_s19 }
  0x2b   :  { %83 = vrot.lane.b32.xlu0 %v82_v14, %s167_s20 }
  0x2c   :  { %95 = vrot.lane.b32.xlu2 %v94_v15, %s168_s21 }
  0x66   :  { %v36_v16 = vpop.permute.xlu2 %35  }
  0x67   :  { %39 = vst.msk [vmem:[#allocation0 + $0x5] sm:$0x1] %vm8_vm0, %v36_v16  }
  0x6e   :  { %v42_v17 = vpop.permute.xlu2 %41  }
  0x6f   :  { %45 = vst.msk [vmem:[#allocation0 + $0x6] sm:$0x1] %vm8_vm0, %v42_v17  }
  0x76   :  { %v60_v18 = vpop.permute.xlu2 %59  }
  0x77   :  { %63 = vst.msk [vmem:[#allocation0 + $0x9] sm:$0x1] %vm8_vm0, %v60_v18  }
  0x7c   :  { %v24_v19 = vpop.permute.xlu1 %23  }
  0x7d   :  { %v12_v20 = vpop.permute.xlu0 %11   ;;  %27 = vst.msk [vmem:[#allocation0 + $0x3] sm:$0x1] %vm8_vm0, %v24_v19  }
  0x7e   :  { %15 = vst.msk [vmem:[#allocation0 + $0x1] sm:$0x1] %vm8_vm0, %v12_v20   ;;  %v78_v22 = vpop.permute.xlu2 %77  }
  0x7f   :  { %81 = vst.msk [vmem:[#allocation0 + $0xc] sm:$0x1] %vm8_vm0, %v78_v22  }
  0x84   :  { %v30_v23 = vpop.permute.xlu1 %29  }
  0x85   :  { %v18_v24 = vpop.permute.xlu0 %17   ;;  %33 = vst.msk [vmem:[#allocation0 + $0x4] sm:$0x1] %vm8_vm0, %v30_v23  }
  0x86   :  { %21 = vst.msk [vmem:[#allocation0 + $0x2] sm:$0x1] %vm8_vm0, %v18_v24   ;;  %v96_v25 = vpop.permute.xlu2 %95  }
  0x87   :  { %99 = vst.msk [vmem:[#allocation0 + $0xf] sm:$0x1] %vm8_vm0, %v96_v25  }
  0x8c   :  { %v54_v26 = vpop.permute.xlu1 %53  }
  0x8d   :  { %v48_v27 = vpop.permute.xlu0 %47   ;;  %57 = vst.msk [vmem:[#allocation0 + $0x8] sm:$0x1] %vm8_vm0, %v54_v26  }
  0x8e   :  { %51 = vst.msk [vmem:[#allocation0 + $0x7] sm:$0x1] %vm8_vm0, %v48_v27  }
  0x94   :  { %v72_v28 = vpop.permute.xlu1 %71  }
  0x95   :  { %v66_v29 = vpop.permute.xlu0 %65   ;;  %75 = vst.msk [vmem:[#allocation0 + $0xb] sm:$0x1] %vm8_vm0, %v72_v28  }
  0x96   :  { %69 = vst.msk [vmem:[#allocation0 + $0xa] sm:$0x1] %vm8_vm0, %v66_v29  }
  0x9c   :  { %v90_v30 = vpop.permute.xlu1 %89  }
  0x9d   :  { %v84_v31 = vpop.permute.xlu0 %83   ;;  %93 = vst.msk [vmem:[#allocation0 + $0xe] sm:$0x1] %vm8_vm0, %v90_v30  }
  0x9e   :  { %87 = vst.msk [vmem:[#allocation0 + $0xd] sm:$0x1] %vm8_vm0, %v84_v31  }
  0x9f   :  { %108 = dma.vmem_to_hbm [thread:$0]  %s104_s23, 256, %s106_s1, [#allocation1]  }
  0xa0   :  { %152 = dma.done.wait [#allocation1], 256  }
  0xa1   :  { %153 = vsyncadd [#allocation1], 4294967040 }
  0xa2   :  { %111 = vsyncpa [#allocation1], 1 }

// kernel: zeta_net_forward.1
= control target key start
LH: loop header
LB: loop body
LE: loop exit
PB: predicated region body
PF: predicated region fallthrough
CT: control target
= control target key end

     0   :  { %v2793_v0 = vmov 2   ;;  %v2794_v1 = vmov 1   ;;  %v2795_v4 = vmov 0   ;;  %vm356_vm0 = vcmask 261120   ;;  %s3839_s1 = inlined_call_operand.vmem [shape: f32[32,3], index: 1, kind: input, shape index: {}]   ;;  %s3840_s2 = inlined_call_operand.vmem [shape: f32[32,1], index: 2, kind: input, shape index: {}]   ;;  %s3841_s4 = inlined_call_operand.vmem [shape: f32[32,1], index: 4, kind: input, shape index: {}]   ;;  %s3842_s6 = inlined_call_operand.vmem [shape: f32[32,1], index: 6, kind: input, shape index: {}]   ;;  %s3843_s7 = inlined_call_operand.vmem [shape: f32[32,1], index: 7, kind: input, shape index: {}]   ;;  %s3844_s0 = inlined_call_operand.vmem [shape: f32[3,512], index: 0, kind: input, shape index: {}]   ;;  %s3845_s3 = inlined_call_operand.vmem [shape: f32[32,32], index: 3, kind: input, shape index: {}]   ;;  %s3846_s5 = inlined_call_operand.vmem [shape: f32[32,32], index: 5, kind: input, shape index: {}]   ;;  %s3847_s8 = inlined_call_operand.<no memory space> [shape: f32[1,1], index: 8, kind: input, shape index: {}]   ;;  %s3848_s9 = inlined_call_operand.vmem [shape: f32[1,512], index: 9, kind: output, shape index: {}]  }
   0x1   :  { %2782 = vset.pattern.permute.xlu2 %v2793_v0  ;;  %2778 = vset.pattern.permute.xlu0 %v2794_v1  ;;  %v36_v2 = vld [vmem:[%s3839_s1 + $0x18] sm:$0xff]  ;;  %v35_v3 = vld [vmem:[%s3839_s1 + $0x10] sm:$0xff]  ;;  %v34_v5 = vld [vmem:[%s3839_s1 + $0x8] sm:$0xff]  ;;  %vm2755_vm5 = vcmask 1040384   ;;  %vm2757_vm10 = vcmask 1042434   ;;  %vm2759_vm11 = vcmask 1041408  }
   0x2   :  { %2780 = vset.pattern.permute.xlu1 %v2795_v4  ;;  %237 = vperm.xlu2 %2782, %v36_v2   ;;  %v33_v6 = vld [vmem:[%s3839_s1] sm:$0xff]  ;;  %v39_v7 = vld [vmem:[%s3840_s2 + $0x10] sm:$0xff]  ;;  %v48_v8 = vld [vmem:[%s3841_s4 + $0x18] sm:$0xff] }
   0x3   :  { %177 = vperm.xlu0 %2778, %v36_v2   ;;  %126 = vperm.xlu1 %2780, %v35_v3   ;;  %v40_v9 = vld [vmem:[%s3840_s2 + $0x18] sm:$0xff]  ;;  %v45_v10 = vld [vmem:[%s3841_s4] sm:$0xff]  ;;  %v38_v11 = vld [vmem:[%s3840_s2 + $0x8] sm:$0xff] }
   0x4   :  { %v37_v12 = vld [vmem:[%s3840_s2] sm:$0xff]  ;;  %v55_v13 = vld [vmem:[%s3842_s6 + $0x10] sm:$0xff]  ;;  %v46_v15 = vld [vmem:[%s3841_s4 + $0x8] sm:$0xff] }
   0x5   :  { %v47_v14 = vld [vmem:[%s3841_s4 + $0x10] sm:$0xff]  ;;  %v58_v16 = vld [vmem:[%s3843_s7 + $0x8] sm:$0xff]  ;;  %v53_v17 = vld [vmem:[%s3842_s6] sm:$0xff] }
   0x6   :  { %v54_v18 = vld [vmem:[%s3842_s6 + $0x8] sm:$0xff]  ;;  %v56_v19 = vld [vmem:[%s3842_s6 + $0x18] sm:$0xff]  ;;  %v57_v20 = vld [vmem:[%s3843_s7] sm:$0xff] }
   0x7   :  { %v59_v21 = vld [vmem:[%s3843_s7 + $0x10] sm:$0xff]  ;;  %v60_v22 = vld [vmem:[%s3843_s7 + $0x18] sm:$0xff]  ;;  %v63_v25 = vld [vmem:[%s3844_s0 + $0x8] sm:$0x77] }
   0x8   :  { %v182_v28 = vperm.slane %v63_v25, 1  ;;  %v183_v29 = vperm.slane %v63_v25, 5  ;;  %v138_v30 = vperm.slane %v63_v25, 0  ;;  %v139_v31 = vperm.slane %v63_v25, 4  ;;  %v62_v37 = vld [vmem:[%s3844_s0] sm:$0x77] }
   0x9   :  { %v243_v33 = vperm.slane %v63_v25, 6  ;;  %v242_v36 = vperm.slane %v63_v25, 2  ;;  %v180_v44 = vperm.slane %v62_v37, 1  ;;  %v136_v47 = vperm.slane %v62_v37, 0 }
   0xa   :  { %2783 = vset.pattern.permute.xlu2 %v2795_v4  ;;  %v2917_v34 = vperm.slane %v182_v28, 1  ;;  %v2919_v35 = vperm.slane %v183_v29, 1  ;;  %v2924_v38 = vperm.slane %v138_v30, 0  ;;  %v147_v39 = vperm.slane %v139_v31, 0 }
   0xb   :  { %2779 = vset.pattern.permute.xlu0 %v2795_v4  ;;  %2781 = vset.pattern.permute.xlu1 %v2794_v1  ;;  %v2926_v40 = vperm.slane %v243_v33, 2  ;;  %v2932_v43 = vperm.slane %v242_v36, 2  ;;  %v181_v55 = vperm.slane %v62_v37, 5  ;;  %v2940_v58 = vperm.slane %v180_v44, 1 }
   0xc   :  { %131 = vperm.xlu0 %2779, %v36_v2   ;;  %173 = vperm.xlu1 %2781, %v35_v3   ;;  %v240_v1 = vperm.slane %v62_v37, 2  ;;  %v144_v2 = vperm.slane %v136_v47, 0 }
   0xd   :  { %121 = vperm.xlu2 %2783, %v34_v5  }
  0x14   :  { %169 = vperm.xlu1 %2781, %v34_v5   ;;  %116 = vperm.xlu0 %2779, %v33_v6  }
  0x15   :  { %2784 = vset.pattern.permute.xlu2 %v2793_v0  ;;  %v137_v0 = vperm.slane %v62_v37, 4 }
  0x16   :  { %233 = vperm.xlu2 %2784, %v35_v3  }
  0x1c   :  { %165 = vperm.xlu1 %2781, %v33_v6   ;;  %296 = vperm.xlu0 %2779, %v39_v7   ;;  %v241_v7 = vperm.slane %v62_v37, 6 }
  0x1e   :  { %229 = vperm.xlu2 %2784, %v34_v5  }
  0x24   :  { %2785 = vset.pattern.permute.xlu1 %v2795_v4  ;;  %353 = vperm.xlu0 %2779, %v48_v8  }
  0x25   :  { %301 = vperm.xlu1 %2785, %v40_v9  }
  0x26   :  { %225 = vperm.xlu2 %2784, %v33_v6  }
  0x2c   :  { %338 = vperm.xlu0 %2779, %v45_v10  }
  0x2d   :  { %291 = vperm.xlu1 %2785, %v38_v11   ;;  %v145_v11 = vperm.slane %v137_v0, 0 }
  0x2e   :  { %2786 = vset.pattern.permute.xlu2 %v2795_v4  ;;  %v189_v4 = vperm.slane %v181_v55, 1 }
  0x2f   :  { %286 = vperm.xlu2 %2786, %v37_v12  }
  0x34   :  { %1509 = vperm.xlu0 %2779, %v55_v13  }
  0x35   :  { %348 = vperm.xlu1 %2785, %v47_v14  }
  0x37   :  { %343 = vperm.xlu2 %2786, %v46_v15   ;;  %v2964_v15 = vperm.slane %v240_v1, 2 }
  0x3c   :  { %2664 = vperm.xlu0 %2779, %v58_v16  }
  0x3d   :  { %1499 = vperm.xlu1 %2785, %v53_v17  }
  0x3f   :  { %1504 = vperm.xlu2 %2786, %v54_v18  }
  0x45   :  { %1514 = vperm.xlu1 %2785, %v56_v19   ;;  %v249_v19 = vperm.slane %v241_v7, 2 }
  0x47   :  { %2659 = vperm.xlu2 %2786, %v57_v20  }
  0x4d   :  { %2669 = vperm.xlu1 %2785, %v59_v21  }
  0x4f   :  { %2674 = vperm.xlu2 %2786, %v60_v22  }
  0x5c   :  { %v2906_v23 = vpop.permute.xlu2 %237 }
  0x5d   :  { %v266_v62 = vmul.f32 %v2932_v43, %v2906_v23  ;;  %v267_v63 = vmul.f32 %v2926_v40, %v2906_v23  ;;  %v265_v7 = vmul.f32 %v249_v19, %v2906_v23 }
  0x67   :  { %v2908_v24 = vpop.permute.xlu2 %121 }
  0x68   :  { %v155_v12 = vmul.f32 %v147_v39, %v2908_v24 }
  0x70   :  { %v2915_v32 = vpop.permute.xlu2 %233 }
  0x71   :  { %v263_v48 = vmul.f32 %v2926_v40, %v2915_v32  ;;  %v260_v20 = vmul.f32 %v2964_v15, %v2915_v32  ;;  %v261_v28 = vmul.f32 %v249_v19, %v2915_v32 }
  0x75   :  { %v127_v26 = vpop.permute.xlu1 %126  ;;  %v2913_v27 = vpop.permute.xlu0 %177 }
  0x76   :  { %v206_v41 = vmul.f32 %v2917_v34, %v2913_v27  ;;  %v207_v42 = vmul.f32 %v2919_v35, %v2913_v27  ;;  %v158_v51 = vmul.f32 %v2924_v38, %v127_v26  ;;  %v159_v52 = vmul.f32 %v147_v39, %v127_v26 }
  0x77   :  { %v156_v16 = vmul.f32 %v144_v2, %v127_v26  ;;  %v157_v22 = vmul.f32 %v145_v11, %v127_v26  ;;  %v204_v29 = vmul.f32 %v2940_v58, %v2913_v27 }
  0x78   :  { %v2942_v59 = vpop.permute.xlu2 %229 }
  0x79   :  { %v259_v13 = vmul.f32 %v2926_v40, %v2942_v59 }
  0x7e   :  { %v132_v45 = vpop.permute.xlu0 %131  ;;  %v174_v46 = vpop.permute.xlu1 %173 }
  0x7f   :  { %v162_v49 = vmul.f32 %v2924_v38, %v132_v45  ;;  %v163_v50 = vmul.f32 %v147_v39, %v132_v45  ;;  %v202_v53 = vmul.f32 %v2917_v34, %v174_v46  ;;  %v203_v54 = vmul.f32 %v2919_v35, %v174_v46 }
  0x80   :  { %v200_v8 = vmul.f32 %v2940_v58, %v174_v46  ;;  %v201_v17 = vmul.f32 %v189_v4, %v174_v46  ;;  %v2973_v30 = vpop.permute.xlu2 %225  ;;  %v161_v26 = vmul.f32 %v145_v11, %v132_v45 }
  0x81   :  { %v222_v56 = vadd.f32 %v206_v41, %v162_v49  ;;  %v223_v57 = vadd.f32 %v207_v42, %v163_v50  ;;  %v2944_v60 = vadd.f32 %v202_v53, %v158_v51  ;;  %v219_v61 = vadd.f32 %v203_v54, %v159_v52 }
  0x82   :  { %v216_v21 = vadd.f32 %v200_v8, %v156_v16  ;;  %v217_v31 = vadd.f32 %v201_v17, %v157_v22  ;;  %v205_v41 = vmul.f32 %v189_v4, %v2913_v27  ;;  %v160_v42 = vmul.f32 %v144_v2, %v132_v45 }
  0x83   :  { %v279_v3 = vadd.f32 %v263_v48, %v219_v61  ;;  %v2950_v5 = vadd.f32 %v266_v62, %v222_v56  ;;  %v2952_v6 = vadd.f32 %v267_v63, %v223_v57  ;;  %v252_v27 = vmul.f32 %v2964_v15, %v2973_v30 }
  0x84   :  { %v276_v47 = vadd.f32 %v260_v20, %v216_v21  ;;  %v255_v45 = vmul.f32 %v2926_v40, %v2973_v30  ;;  %v220_v56 = vadd.f32 %v204_v29, %v160_v42  ;;  %v221_v57 = vadd.f32 %v205_v41, %v161_v26 }
  0x85   :  { %v253_v61 = vmul.f32 %v249_v19, %v2973_v30  ;;  %v153_v21 = vmul.f32 %v145_v11, %v2908_v24 }
  0x86   :  { %v2955_v9 = vpop.permute.xlu1 %169  ;;  %v2957_v10 = vpop.permute.xlu0 %116 }
  0x87   :  { %v199_v14 = vmul.f32 %v2919_v35, %v2955_v9  ;;  %v148_v33 = vmul.f32 %v144_v2, %v2957_v10  ;;  %v149_v36 = vmul.f32 %v145_v11, %v2957_v10  ;;  %v151_v37 = vmul.f32 %v147_v39, %v2957_v10  ;;  %v41_v39 = vld [vmem:[%s3845_s3] sm:$0xff] }
  0x88   :  { %v358_v62 = vsel %vm356_vm0, %v41_v39, 0  ;;  %v256_v11 = vmul.f32 %v2964_v15, %v2942_v59 }
  0x89   :  { %v215_v18 = vadd.f32 %v199_v14, %v155_v12  ;;  %v152_v12 = vmul.f32 %v144_v2, %v2908_v24  ;;  %v197_v14 = vmul.f32 %v189_v4, %v2955_v9  ;;  %v3011_v16 = vpop.permute.xlu2 %286  ;;  %v3013_v20 = vand.u32 4294901760, %v358_v62 }
  0x8b   :  { %v2968_v25 = vadd.f32 %v259_v13, %v215_v18  ;;  %v196_v13 = vmul.f32 %v2940_v58, %v2955_v9  ;;  %v281_v18 = vadd.f32 %v265_v7, %v221_v57  ;;  %v213_v41 = vadd.f32 %v197_v14, %v153_v21 }
  0x8e   :  { %v2979_v44 = vpop.permute.xlu1 %165  ;;  %v2981_v46 = vpop.permute.xlu0 %296 }
  0x8f   :  { %v192_v48 = vmul.f32 %v2940_v58, %v2979_v44  ;;  %v193_v49 = vmul.f32 %v189_v4, %v2979_v44  ;;  %v195_v50 = vmul.f32 %v2919_v35, %v2979_v44  ;;  %v312_v51 = vadd.f32 %v2981_v46, %v276_v47 }
  0x90   :  { %v2997_v52 = vadd.f32 %v2981_v46, %v279_v3  ;;  %v277_v35 = vadd.f32 %v261_v28, %v217_v31  ;;  %v264_v3 = vmul.f32 %v2964_v15, %v2906_v23  ;;  %v3035_v47 = vsub.f32 %v358_v62, %v3013_v20 }
  0x91   :  { %v208_v53 = vadd.f32 %v192_v48, %v148_v33  ;;  %v209_v54 = vadd.f32 %v193_v49, %v149_v36  ;;  %v211_v55 = vadd.f32 %v195_v50, %v151_v37  ;;  %v328_v1 = vmax.f32 %v312_v51, 0.0  ;;  %v42_v37 = vld [vmem:[%s3845_s3 + $0x8] sm:$0xff] }
  0x92   :  { %v313_v40 = vadd.f32 %v2981_v46, %v277_v35  ;;  %v280_v17 = vadd.f32 %v264_v3, %v220_v56  ;;  %v257_v33 = vmul.f32 %v249_v19, %v2942_v59  ;;  %v212_v36 = vadd.f32 %v196_v13, %v152_v12 }
  0x93   :  { %v268_v63 = vadd.f32 %v252_v27, %v208_v53  ;;  %v3001_v0 = vadd.f32 %v255_v45, %v211_v55  ;;  %v269_v8 = vadd.f32 %v253_v61, %v209_v54  ;;  %v3018_v23 = vand.u32 4294901760, %v328_v1 }
  0x94   :  { %v329_v22 = vmax.f32 %v313_v40, 0.0  ;;  %v361_v39 = vsel %vm356_vm0, %v42_v37, 0  ;;  %v272_v27 = vadd.f32 %v256_v11, %v212_v36  ;;  %v273_v45 = vadd.f32 %v257_v33, %v213_v41 }
  0x95   :  { %v304_v2 = vadd.f32 %v3011_v16, %v268_v63  ;;  %v305_v31 = vadd.f32 %v3011_v16, %v269_v8  ;;  %v3040_v48 = vsub.f32 %v328_v1, %v3018_v23  ;;  %v3051_v53 = vand.u32 4294901760, %v3035_v47 }
  0x96   :  { %v3064_v61 = vand.u32 4294901760, %v361_v39 }
  0x97   :  { %v3016_v28 = vpop.permute.xlu1 %301  ;;  %v320_v49 = vmax.f32 %v304_v2, 0.0  ;;  %v321_v50 = vmax.f32 %v305_v31, 0.0  ;;  %v442_v56 = vand.u32 4294901760, %v3040_v48  ;;  %v392_v13 = vsub.f32 %v3035_v47, %v3051_v53 }
  0x98   :  { %v316_v29 = vadd.f32 %v3016_v28, %v280_v17  ;;  %v317_v58 = vadd.f32 %v3016_v28, %v281_v18  ;;  %v3025_v4 = vadd.f32 %v3016_v28, %v2952_v6  ;;  %v3037_v6 = vand.u32 4294901760, %v329_v22 }
  0x99   :  { %v3058_v35 = vand.u32 4294901760, %v320_v49  ;;  %v3073_v1 = vand.u32 4294901760, %v321_v50  ;;  %v3083_v18 = vsub.f32 %v361_v39, %v3064_v61  ;;  %v3102_v36 = vand.u32 4294901760, %v392_v13 }
  0x9a   :  { %v332_v42 = vmax.f32 %v316_v29, 0.0  ;;  %v333_v26 = vmax.f32 %v317_v58, 0.0  ;;  %v3062_v57 = vsub.f32 %v329_v22, %v3037_v6  ;;  %v43_v58 = vld [vmem:[%s3845_s3 + $0x10] sm:$0xff] }
  0x9b   :  { %v453_v17 = vsub.f32 %v320_v49, %v3058_v35  ;;  %v3091_v29 = vsub.f32 %v321_v50, %v3073_v1 }
  0x9c   :  { %v3042_v15 = vand.u32 4294901760, %v333_v26  ;;  %v3044_v19 = vand.u32 4294901760, %v332_v42  ;;  %v720_v2 = vand.u32 4294901760, %v3062_v57 }
  0x9e   :  { %382 = vmatpush.msra.mxu0 %v3044_v19  ;;  %533 = vmatpush.msra.mxu3 %v3044_v19  ;;  %v435_v51 = vsub.f32 %v332_v42, %v3044_v19  ;;  %v3054_v54 = vsub.f32 %v333_v26, %v3042_v15  ;;  %v454_v42 = vand.u32 4294901760, %v453_v17  ;;  %v3108_v26 = vand.u32 4294901760, %v3083_v18 }
  0x9f   :  { %v3056_v55 = vpop.permute.xlu1 %291  ;;  %v721_v49 = vsub.f32 %v3062_v57, %v720_v2 }
  0xa0   :  { %v308_v62 = vadd.f32 %v3056_v55, %v272_v27  ;;  %v309_v63 = vadd.f32 %v3056_v55, %v273_v45  ;;  %v3070_v40 = vadd.f32 %v3056_v55, %v2968_v25  ;;  %384 = vmatpush.msra.mxu0 %v3018_v23  ;;  %489 = vmatpush.msra.mxu2 %v435_v51  ;;  %v436_v3 = vand.u32 4294901760, %v435_v51 }
  0xa1   :  { %535 = vmatpush.msra.mxu3 %v3018_v23  ;;  %v714_v7 = vand.u32 4294901760, %v3054_v54  ;;  %v443_v25 = vsub.f32 %v3040_v48, %v442_v56  ;;  %v732_v27 = vand.u32 4294901760, %v3091_v29  ;;  %v722_v13 = vand.u32 4294901760, %v721_v49 }
  0xa2   :  { %v324_v8 = vmax.f32 %v308_v62, 0.0  ;;  %v325_v12 = vmax.f32 %v309_v63, 0.0  ;;  %492 = vmatpush.msra.mxu2 %v3040_v48  ;;  %v437_v14 = vsub.f32 %v435_v51, %v436_v3  ;;  %v364_v48 = vsel %vm356_vm0, %v43_v58, 0 }
  0xa3   :  { %v715_v11 = vsub.f32 %v3054_v54, %v714_v7  ;;  %v444_v41 = vand.u32 4294901760, %v443_v25  ;;  %v3123_v63 = vand.u32 4294901760, %v364_v48  ;;  %v733_v58 = vsub.f32 %v3091_v29, %v732_v27 }
  0xa4   :  { %v3085_v21 = vand.u32 4294901760, %v325_v12  ;;  %v3087_v22 = vand.u32 4294901760, %v324_v8  ;;  %v438_v31 = vand.u32 4294901760, %v437_v14 }
  0xa5   :  { %v716_v45 = vand.u32 4294901760, %v715_v11 }
  0xa6   :  { %386 = vmatpush.msra.mxu0 %v3087_v22  ;;  %537 = vmatpush.msra.mxu3 %v3087_v22  ;;  %v447_v33 = vsub.f32 %v324_v8, %v3087_v22  ;;  %v3105_v37 = vsub.f32 %v325_v12, %v3085_v21  ;;  %v455_v8 = vsub.f32 %v453_v17, %v454_v42 }
  0xa7   :  { %439 = vmatpush.msra.mxu1 %v438_v31  ;;  %v400_v12 = vsub.f32 %v3083_v18, %v3108_v26  ;;  %v44_v31 = vld [vmem:[%s3845_s3 + $0x18] sm:$0xff] }
  0xa8   :  { %388 = vmatpush.msra.mxu0 %v3058_v35  ;;  %495 = vmatpush.msra.mxu2 %v447_v33  ;;  %v448_v50 = vand.u32 4294901760, %v447_v33  ;;  %v726_v39 = vand.u32 4294901760, %v3105_v37  ;;  %v456_v11 = vand.u32 4294901760, %v455_v8 }
  0xa9   :  { %445 = vmatpush.msra.mxu1 %v444_v41  ;;  %539 = vmatpush.msra.mxu3 %v3058_v35  ;;  %v734_v41 = vand.u32 4294901760, %v733_v58 }
  0xaa   :  { %394 = vmatmul.f32.vlgmr.msra.gmra.mxu0 %v3102_v36  ;;  %543 = vmatmul.f32.vlgmr.msra.gmra.mxu3 %v3051_v53  ;;  %v449_v51 = vsub.f32 %v447_v33, %v448_v50  ;;  %v727_v62 = vsub.f32 %v3105_v37, %v726_v39  ;;  %v367_v33 = vsel %vm356_vm0, %v44_v31, 0  ;;  %v335_v31 = vmax.f32 %v3025_v4, 0.0 }
  0xab   :  { %580 = vmatpush.msrb.mxu0 %v436_v3  ;;  %717 = vmatpush.msrb.mxu3 %v716_v45  ;;  %v3136_v3 = vsub.f32 %v364_v48, %v3123_v63  ;;  %v194_v45 = vmul.f32 %v2917_v34, %v2979_v44 }
  0xac   :  { %498 = vmatpush.msra.mxu2 %v453_v17  ;;  %v450_v14 = vand.u32 4294901760, %v449_v51  ;;  %v728_v25 = vand.u32 4294901760, %v727_v62  ;;  %v3140_v17 = vadd.f32 %v3011_v16, %v3001_v0  ;;  %v3150_v0 = vand.u32 4294901760, %v367_v33 }
  0xad   :  { %501 = vmatmul.f32.vlgmr.msra.gmra.mxu2 %v3035_v47  ;;  %584 = vmatpush.msrb.mxu0 %v442_v56  ;;  %v3144_v56 = vand.u32 4294901760, %v400_v12  ;;  %v3148_v48 = vand.u32 4294901760, %v3136_v3 }
  0xae   :  { %660 = vmatpush.msrb.mxu2 %v3042_v15  ;;  %723 = vmatpush.msrb.mxu3 %v722_v13  ;;  %v3163_v49 = vsub.f32 %v367_v33, %v3150_v0  ;;  %v323_v4 = vmax.f32 %v3140_v17, 0.0 }
  0xaf   :  { %588 = vmatpush.msrb.mxu0 %v448_v50  ;;  %451 = vmatpush.msra.mxu1 %v450_v14  ;;  %v150_v50 = vmul.f32 %v2924_v38, %v2957_v10 }
  0xb0   :  { %662 = vmatpush.msrb.mxu2 %v3037_v6  ;;  %729 = vmatpush.msrb.mxu3 %v728_v25  ;;  %v3188_v10 = vand.u32 4294901760, %v3163_v49 }
  0xb1   :  { %592 = vmatpush.msrb.mxu0 %v454_v42  ;;  %457 = vmatpush.msra.mxu1 %v456_v11  ;;  %v408_v42 = vsub.f32 %v3136_v3, %v3148_v48  ;;  %v210_v44 = vadd.f32 %v194_v45, %v150_v50 }
  0xb2   :  { %664 = vmatpush.msrb.mxu2 %v3085_v21  ;;  %735 = vmatpush.msrb.mxu3 %v734_v41  ;;  %v331_v41 = vmax.f32 %v2997_v52, 0.0 }
  0xb3   :  { %767 = vmatpush.msra.mxu0 %v3054_v54  ;;  %459 = vmatmul.f32.vlgmr.msra.gmra.mxu1 %v3013_v20 }
  0xb4   :  { %402 = vmatmul.f32.gmra.mxu0 %v3144_v56  ;;  %549 = vmatmul.f32.gmra.mxu3 %v3108_v26  ;;  %v3285_v50 = vand.u32 4294901760, %v331_v41 }
  0xb5   :  { %623 = vmatpush.msrb.mxu1 %v3044_v19  ;;  %666 = vmatpush.msrb.mxu2 %v3073_v1  ;;  %v198_v19 = vmul.f32 %v2917_v34, %v2955_v9  ;;  %v262_v9 = vmul.f32 %v2932_v43, %v2915_v32  ;;  %v3185_v34 = vand.u32 4294901760, %v408_v42  ;;  %v254_v32 = vmul.f32 %v2932_v43, %v2973_v30 }
  0xb6   :  { %901 = vmatpush.msra.mxu3 %v3042_v15  ;;  %770 = vmatpush.msra.mxu0 %v3062_v57  ;;  %v318_v57 = vadd.f32 %v3016_v28, %v2950_v5  ;;  %v3279_v42 = vand.u32 4294901760, %v335_v31 }
  0xb7   :  { %858 = vmatpush.msra.mxu2 %v714_v7  ;;  %625 = vmatpush.msrb.mxu1 %v3018_v23  ;;  %v154_v23 = vmul.f32 %v2924_v38, %v2908_v24  ;;  %v258_v24 = vmul.f32 %v2932_v43, %v2942_v59  ;;  %v278_v54 = vadd.f32 %v262_v9, %v2944_v60  ;;  %v3293_v9 = vand.u32 4294901760, %v323_v4 }
  0xb8   :  { %506 = vmatmul.f32.gmra.mxu2 %v3083_v18  ;;  %903 = vmatpush.msra.mxu3 %v3037_v6  ;;  %v416_v59 = vsub.f32 %v3163_v49, %v3188_v10  ;;  %v270_v43 = vadd.f32 %v254_v32, %v210_v44  ;;  %v334_v60 = vmax.f32 %v318_v57, 0.0  ;;  %v1269_v45 = vsub.f32 %v335_v31, %v3279_v42 }
  0xb9   :  { %773 = vmatpush.msra.mxu0 %v3105_v37  ;;  %862 = vmatpush.msra.mxu2 %v720_v2  ;;  %v214_v38 = vadd.f32 %v198_v19, %v154_v23  ;;  %v314_v30 = vadd.f32 %v2981_v46, %v278_v54  ;;  %v327_v19 = vmax.f32 %v3070_v40, 0.0  ;;  %v1275_v23 = vsub.f32 %v331_v41, %v3285_v50 }
  0xba   :  { %627 = vmatpush.msrb.mxu1 %v3087_v22  ;;  %905 = vmatpush.msra.mxu3 %v3085_v21  ;;  %v3215_v28 = vand.u32 4294901760, %v416_v59  ;;  %v306_v7 = vadd.f32 %v3011_v16, %v270_v43  ;;  %v3221_v46 = vand.u32 4294901760, %v334_v60  ;;  %v1270_v40 = vand.u32 4294901760, %v1269_v45 }
  0xbb   :  { %776 = vmatpush.msra.mxu0 %v3091_v29  ;;  %866 = vmatpush.msra.mxu2 %v726_v39  ;;  %v3290_v52 = vand.u32 4294901760, %v327_v19  ;;  %v1276_v17 = vand.u32 4294901760, %v1275_v23 }
  0xbc   :  { %629 = vmatpush.msrb.mxu1 %v3058_v35  ;;  %907 = vmatpush.msra.mxu3 %v3073_v1  ;;  %v330_v35 = vmax.f32 %v314_v30, 0.0  ;;  %v1271_v44 = vsub.f32 %v1269_v45, %v1270_v40 }
  0xbd   :  { %870 = vmatpush.msra.mxu2 %v732_v27  ;;  %410 = vmatmul.f32.gmra.mxu0 %v3185_v34  ;;  %v1277_v54 = vsub.f32 %v1275_v23, %v1276_v17 }
  0xbe   :  { %811 = vmatpush.msra.mxu1 %v3042_v15  ;;  %555 = vmatmul.f32.gmra.mxu3 %v3148_v48  ;;  %v274_v15 = vadd.f32 %v258_v24, %v214_v38  ;;  %v1281_v24 = vsub.f32 %v327_v19, %v3290_v52  ;;  %v1287_v38 = vsub.f32 %v323_v4, %v3293_v9  ;;  %v1272_v59 = vand.u32 4294901760, %v1271_v44 }
  0xbf   :  { %463 = vmatmul.f32.gmra.mxu1 %v3064_v61  ;;  %v1278_v30 = vand.u32 4294901760, %v1277_v54 }
  0xc0   :  { %813 = vmatpush.msra.mxu1 %v3037_v6  ;;  %511 = vmatmul.f32.gmra.mxu2 %v3136_v3  ;;  %v310_v5 = vadd.f32 %v3056_v55, %v274_v15  ;;  %v3225_v6 = vand.u32 4294901760, %v330_v35  ;;  %v322_v55 = vmax.f32 %v306_v7, 0.0  ;;  %v1282_v32 = vand.u32 4294901760, %v1281_v24 }
  0xc1   :  { %v1288_v57 = vand.u32 4294901760, %v1287_v38 }
  0xc2   :  { %815 = vmatpush.msra.mxu1 %v3085_v21  ;;  %v326_v22 = vmax.f32 %v310_v5, 0.0  ;;  %v3228_v21 = vsub.f32 %v334_v60, %v3221_v46  ;;  %v3233_v16 = vsub.f32 %v330_v35, %v3225_v6  ;;  %v3235_v2 = vand.u32 4294901760, %v322_v55 }
  0xc3   :  { %v1283_v43 = vsub.f32 %v1281_v24, %v1282_v32  ;;  %v1289_v15 = vsub.f32 %v1287_v38, %v1288_v57 }
  0xc4   :  { %817 = vmatpush.msra.mxu1 %v3073_v1  ;;  %v3230_v1 = vand.u32 4294901760, %v326_v22  ;;  %v992_v37 = vand.u32 4294901760, %v3228_v21  ;;  %v3248_v39 = vsub.f32 %v322_v55, %v3235_v2  ;;  %v998_v27 = vand.u32 4294901760, %v3233_v16 }
  0xc5   :  { %418 = vmatmul.f32.gmra.mxu0 %v3215_v28  ;;  %v1284_v60 = vand.u32 4294901760, %v1283_v43  ;;  %v1290_v5 = vand.u32 4294901760, %v1289_v15 }
  0xc6   :  { %561 = vmatmul.f32.gmra.mxu3 %v3188_v10  ;;  %v3240_v29 = vsub.f32 %v326_v22, %v3230_v1  ;;  %v993_v51 = vsub.f32 %v3228_v21, %v992_v37  ;;  %v999_v8 = vsub.f32 %v3233_v16, %v998_v27  ;;  %v1010_v12 = vand.u32 4294901760, %v3248_v39 }
  0xc7   :  { %467 = vmatmul.f32.gmra.mxu1 %v3123_v63 }
  0xc8   :  { %516 = vmatmul.f32.gmra.mxu2 %v3163_v49  ;;  %v1004_v62 = vand.u32 4294901760, %v3240_v29  ;;  %v994_v13 = vand.u32 4294901760, %v993_v51  ;;  %v1000_v25 = vand.u32 4294901760, %v999_v8  ;;  %v1011_v58 = vsub.f32 %v3248_v39, %v1010_v12 }
  0xca   :  { %v1005_v14 = vsub.f32 %v3240_v29, %v1004_v62  ;;  %v1012_v33 = vand.u32 4294901760, %v1011_v58 }
  0xcc   :  { %v1006_v11 = vand.u32 4294901760, %v1005_v14  ;;  %v3385_v14 = vpop.permute.xlu1 %348 }
  0xcd   :  { %594 = vmatmul.f32.vlgmr.msrb.gmra.mxu0 %v3013_v20 }
  0xce   :  { %737 = vmatmul.f32.vlgmr.msrb.gmra.mxu3 %v3013_v20  ;;  %938 = vmatpush.msrb.mxu0 %v3221_v46 }
  0xcf   :  { %471 = vmatmul.f32.gmra.mxu1 %v3150_v0  ;;  %1089 = vmatpush.msrb.mxu3 %v3221_v46 }
  0xd0   :  { %672 = vmatmul.f32.vlgmr.msrb.gmra.mxu2 %v3102_v36  ;;  %940 = vmatpush.msrb.mxu0 %v3225_v6 }
  0xd1   :  { %1045 = vmatpush.msrb.mxu2 %v3228_v21  ;;  %1091 = vmatpush.msrb.mxu3 %v3225_v6 }
  0xd2   :  { %942 = vmatpush.msrb.mxu0 %v3230_v1 }
  0xd3   :  { %1048 = vmatpush.msrb.mxu2 %v3233_v16  ;;  %1093 = vmatpush.msrb.mxu3 %v3230_v1 }
  0xd4   :  { %944 = vmatpush.msrb.mxu0 %v3235_v2 }
  0xd5   :  { %1051 = vmatpush.msrb.mxu2 %v3240_v29  ;;  %1095 = vmatpush.msrb.mxu3 %v3235_v2 }
  0xd6   :  { %598 = vmatmul.f32.gmra.mxu0 %v3064_v61  ;;  %741 = vmatmul.f32.gmra.mxu3 %v3064_v61 }
  0xd7   :  { %631 = vmatmul.f32.vlgmr.msrb.gmra.mxu1 %v3013_v20  ;;  %1054 = vmatpush.msrb.mxu2 %v3248_v39 }
  0xd8   :  { %995 = vmatpush.msrb.mxu1 %v994_v13  ;;  %680 = vmatmul.f32.gmra.mxu2 %v3144_v56  ;;  %v3383_v13 = vpop.permute.xlu2 %343 }
  0xda   :  { %1001 = vmatpush.msrb.mxu1 %v1000_v25 }
  0xdc   :  { %1007 = vmatpush.msrb.mxu1 %v1006_v11 }
  0xde   :  { %1013 = vmatpush.msrb.mxu1 %v1012_v33  ;;  %602 = vmatmul.f32.gmra.mxu0 %v3123_v63 }
  0xdf   :  { %635 = vmatmul.f32.gmra.mxu1 %v3064_v61  ;;  %745 = vmatmul.f32.gmra.mxu3 %v3123_v63 }
  0xe0   :  { %688 = vmatmul.f32.gmra.mxu2 %v3185_v34 }
  0xe6   :  { %606 = vmatmul.f32.gmra.mxu0 %v3150_v0 }
  0xe7   :  { %639 = vmatmul.f32.gmra.mxu1 %v3123_v63  ;;  %749 = vmatmul.f32.gmra.mxu3 %v3150_v0 }
  0xe8   :  { %696 = vmatmul.f32.gmra.mxu2 %v3215_v28 }
  0xee   :  { %779 = vmatmul.f32.vlgmr.msra.gmra.mxu0 %v3035_v47 }
  0xef   :  { %643 = vmatmul.f32.gmra.mxu1 %v3150_v0  ;;  %909 = vmatmul.f32.vlgmr.msra.gmra.mxu3 %v3013_v20 }
  0xf0   :  { %1136 = vmatpush.msra.mxu0 %v992_v37  ;;  %1273 = vmatpush.msra.mxu3 %v1272_v59 }
  0xf1   :  { %872 = vmatmul.f32.vlgmr.msra.gmra.mxu2 %v3013_v20 }
  0xf2   :  { %1140 = vmatpush.msra.mxu0 %v998_v27  ;;  %1216 = vmatpush.msra.mxu2 %v3279_v42 }
  0xf3   :  { %1279 = vmatpush.msra.mxu3 %v1278_v30 }
  0xf4   :  { %1144 = vmatpush.msra.mxu0 %v1004_v62  ;;  %1218 = vmatpush.msra.mxu2 %v3285_v50  ;;  %v3373_v62 = vpop.permute.xlu0 %353 }
  0xf5   :  { %1285 = vmatpush.msra.mxu3 %v1284_v60 }
  0xf6   :  { %1148 = vmatpush.msra.mxu0 %v1010_v12  ;;  %1220 = vmatpush.msra.mxu2 %v3290_v52 }
  0xf7   :  { %1291 = vmatpush.msra.mxu3 %v1290_v5  ;;  %784 = vmatmul.f32.gmra.mxu0 %v3083_v18  ;;  %v50_v5 = vld [vmem:[%s3846_s5 + $0x8] sm:$0xff] }
  0xf8   :  { %821 = vmatmul.f32.vlgmr.msra.gmra.mxu1 %v3051_v53  ;;  %913 = vmatmul.f32.gmra.mxu3 %v3064_v61 }
  0xf9   :  { %1179 = vmatpush.msra.mxu1 %v3221_v46  ;;  %1222 = vmatpush.msra.mxu2 %v3293_v9 }
  0xfa   :  { %876 = vmatmul.f32.gmra.mxu2 %v3064_v61 }
  0xfb   :  { %1181 = vmatpush.msra.mxu1 %v3225_v6 }
  0xfc   :  { %v3389_v58 = vpop.permute.xlu0 %338 }
  0xfd   :  { %1183 = vmatpush.msra.mxu1 %v3230_v1 }
  0xff   :  { %1185 = vmatpush.msra.mxu1 %v3235_v2  ;;  %789 = vmatmul.f32.gmra.mxu0 %v3136_v3 }
 0x100   :  { %827 = vmatmul.f32.gmra.mxu1 %v3108_v26  ;;  %917 = vmatmul.f32.gmra.mxu3 %v3123_v63 }
 0x102   :  { %880 = vmatmul.f32.gmra.mxu2 %v3123_v63 }
 0x107   :  { %794 = vmatmul.f32.gmra.mxu0 %v3163_v49 }
 0x108   :  { %833 = vmatmul.f32.gmra.mxu1 %v3148_v48  ;;  %921 = vmatmul.f32.gmra.mxu3 %v3150_v0 }
 0x10a   :  { %884 = vmatmul.f32.gmra.mxu2 %v3150_v0 }
 0x10f   :  { %950 = vmatmul.f32.vlgmr.msrb.gmra.mxu0 %v3102_v36 }
 0x110   :  { %839 = vmatmul.f32.gmra.mxu1 %v3188_v10  ;;  %1099 = vmatmul.f32.vlgmr.msrb.gmra.mxu3 %v3051_v53 }
 0x111   :  { %1323 = vmatpush.msrb.mxu0 %v1269_v45  ;;  %1457 = vmatpush.msrb.mxu3 %v3279_v42 }
 0x112   :  { %1057 = vmatmul.f32.vlgmr.msrb.gmra.mxu2 %v3035_v47 }
 0x113   :  { %1326 = vmatpush.msrb.mxu0 %v1275_v23  ;;  %1414 = vmatpush.msrb.mxu2 %v1270_v40 }
 0x114   :  { %1459 = vmatpush.msrb.mxu3 %v3285_v50 }
 0x115   :  { %1329 = vmatpush.msrb.mxu0 %v1281_v24  ;;  %1418 = vmatpush.msrb.mxu2 %v1276_v17 }
 0x116   :  { %1461 = vmatpush.msrb.mxu3 %v3290_v52 }
 0x117   :  { %1332 = vmatpush.msrb.mxu0 %v1287_v38  ;;  %1422 = vmatpush.msrb.mxu2 %v1282_v32 }
 0x118   :  { %1463 = vmatpush.msrb.mxu3 %v3293_v9  ;;  %958 = vmatmul.f32.gmra.mxu0 %v3144_v56 }
 0x119   :  { %1015 = vmatmul.f32.vlgmr.msrb.gmra.mxu1 %v3013_v20  ;;  %1426 = vmatpush.msrb.mxu2 %v1288_v57 }
 0x11a   :  { %1367 = vmatpush.msrb.mxu1 %v3279_v42  ;;  %1062 = vmatmul.f32.gmra.mxu2 %v3083_v18 }
 0x11b   :  { %1105 = vmatmul.f32.gmra.mxu3 %v3108_v26 }
 0x11c   :  { %1369 = vmatpush.msrb.mxu1 %v3285_v50 }
 0x11e   :  { %1371 = vmatpush.msrb.mxu1 %v3290_v52 }
 0x120   :  { %1373 = vmatpush.msrb.mxu1 %v3293_v9  ;;  %966 = vmatmul.f32.gmra.mxu0 %v3185_v34 }
 0x121   :  { %1019 = vmatmul.f32.gmra.mxu1 %v3064_v61 }
 0x122   :  { %1067 = vmatmul.f32.gmra.mxu2 %v3136_v3 }
 0x123   :  { %1111 = vmatmul.f32.gmra.mxu3 %v3148_v48 }
 0x127   :  { %v395_v35 = vpop.f32.mrf.mxu0 }
 0x128   :  { %974 = vmatmul.f32.gmra.mxu0 %v3215_v28  ;;  %v396_v31 = vadd.f32 %v395_v35, %v3389_v58 }
 0x129   :  { %1023 = vmatmul.f32.gmra.mxu1 %v3123_v63 }
 0x12a   :  { %1072 = vmatmul.f32.gmra.mxu2 %v3163_v49 }
 0x12b   :  { %1117 = vmatmul.f32.gmra.mxu3 %v3188_v10 }
 0x12d   :  { %v3355_v7 = vpop.f32.mrf.mxu3 }
 0x130   :  { %1150 = vmatmul.f32.vlgmr.msra.gmra.mxu0 %v3013_v20  ;;  %v460_v46 = vpop.f32.mrf.mxu1  ;;  %v502_v6 = vpop.f32.mrf.mxu2 }
 0x131   :  { %1027 = vmatmul.f32.gmra.mxu1 %v3150_v0  ;;  %v403_v22 = vpop.f32.mrf.mxu0  ;;  %v461_v41 = vadd.f32 %v460_v46, %v396_v31 }
 0x132   :  { %1228 = vmatmul.f32.vlgmr.msra.gmra.mxu2 %v3102_v36  ;;  %v404_v25 = vadd.f32 %v403_v22, %v3383_v13 }
 0x133   :  { %1293 = vmatmul.f32.vlgmr.msra.gmra.mxu3 %v3013_v20 }
 0x137   :  { %v550_v55 = vpop.f32.mrf.mxu3 }
 0x138   :  { %1154 = vmatmul.f32.gmra.mxu0 %v3064_v61 }
 0x139   :  { %1187 = vmatmul.f32.vlgmr.msra.gmra.mxu1 %v3013_v20 }
 0x13a   :  { %1236 = vmatmul.f32.gmra.mxu2 %v3144_v56  ;;  %v411_v21 = vpop.f32.mrf.mxu0 }
 0x13b   :  { %1297 = vmatmul.f32.gmra.mxu3 %v3064_v61  ;;  %v507_v16 = vpop.f32.mrf.mxu2 }
 0x13c   :  { %v464_v1 = vpop.f32.mrf.mxu1 }
 0x13d   :  { %v465_v11 = vadd.f32 %v464_v1, %v404_v25 }
 0x13f   :  { %v508_v4 = vadd.f32 %v507_v16, %v465_v11 }
 0x140   :  { %1158 = vmatmul.f32.gmra.mxu0 %v3123_v63 }
 0x141   :  { %1191 = vmatmul.f32.gmra.mxu1 %v3064_v61  ;;  %v556_v36 = vpop.f32.mrf.mxu3  ;;  %v551_v23 = vadd.f32 %v550_v55, %v508_v4 }
 0x142   :  { %1244 = vmatmul.f32.gmra.mxu2 %v3185_v34  ;;  %v419_v2 = vpop.f32.mrf.mxu0 }
 0x143   :  { %1301 = vmatmul.f32.gmra.mxu3 %v3123_v63  ;;  %v512_v37 = vpop.f32.mrf.mxu2  ;;  %v420_v52 = vadd.f32 %v419_v2, %v3373_v62 }
 0x144   :  { %v468_v29 = vpop.f32.mrf.mxu1 }
 0x148   :  { %1162 = vmatmul.f32.gmra.mxu0 %v3150_v0 }
 0x149   :  { %1195 = vmatmul.f32.gmra.mxu1 %v3123_v63  ;;  %v562_v56 = vpop.f32.mrf.mxu3 }
 0x14a   :  { %1252 = vmatmul.f32.gmra.mxu2 %v3215_v28  ;;  %v595_v27 = vpop.f32.mrf.mxu0 }
 0x14b   :  { %1305 = vmatmul.f32.gmra.mxu3 %v3150_v0  ;;  %v517_v51 = vpop.f32.mrf.mxu2 }
 0x14c   :  { %v472_v39 = vpop.f32.mrf.mxu1 }
 0x14d   :  { %v473_v40 = vadd.f32 %v472_v39, %v420_v52 }
 0x14f   :  { %v518_v57 = vadd.f32 %v517_v51, %v473_v40  ;;  %v52_v40 = vld [vmem:[%s3846_s5 + $0x18] sm:$0xff] }
 0x150   :  { %1335 = vmatmul.f32.vlgmr.msrb.gmra.mxu0 %v3035_v47  ;;  %v412_v47 = vadd.f32 %v411_v21, %v3385_v14  ;;  %v1521_v21 = vsel %vm356_vm0, %v50_v5, 0 }
 0x151   :  { %1199 = vmatmul.f32.gmra.mxu1 %v3150_v0  ;;  %v3378_v34 = vpop.f32.mrf.mxu3 }
 0x152   :  { %1428 = vmatmul.f32.vlgmr.msrb.gmra.mxu2 %v3013_v20  ;;  %v469_v33 = vadd.f32 %v468_v29, %v412_v47  ;;  %v3440_v29 = vand.u32 4294901760, %v1521_v21 }
 0x153   :  { %v599_v8 = vpop.f32.mrf.mxu0  ;;  %1465 = vmatmul.f32.vlgmr.msrb.gmra.mxu3 %v3013_v20  ;;  %v3381_v12 = vpop.f32.mrf.mxu2 }
 0x154   :  { %v632_v28 = vpop.f32.mrf.mxu1  ;;  %v513_v45 = vadd.f32 %v512_v37, %v469_v33  ;;  %v600_v17 = vadd.f32 %v599_v8, %v551_v23  ;;  %v3457_v25 = vsub.f32 %v1521_v21, %v3440_v29 }
 0x156   :  { %v557_v9 = vadd.f32 %v556_v36, %v513_v45 }
 0x158   :  { %1340 = vmatmul.f32.gmra.mxu0 %v3083_v18  ;;  %v503_v18 = vadd.f32 %v502_v6, %v461_v41 }
 0x159   :  { %1377 = vmatmul.f32.vlgmr.msrb.gmra.mxu1 %v3051_v53  ;;  %v3395_v20 = vpop.f32.mrf.mxu3  ;;  %v49_v53 = vld [vmem:[%s3846_s5] sm:$0xff] }
 0x15a   :  { %1432 = vmatmul.f32.gmra.mxu2 %v3064_v61  ;;  %v545_v24 = vadd.f32 %v3355_v7, %v503_v18  ;;  %v3471_v18 = vand.u32 4294901760, %v3457_v25 }
 0x15b   :  { %v603_v42 = vpop.f32.mrf.mxu0  ;;  %1469 = vmatmul.f32.gmra.mxu3 %v3064_v61  ;;  %v3398_v50 = vpop.f32.mrf.mxu2 }
 0x15c   :  { %v636_v19 = vpop.f32.mrf.mxu1  ;;  %v604_v38 = vadd.f32 %v603_v42, %v557_v9  ;;  %v596_v59 = vadd.f32 %v595_v27, %v545_v24 }
 0x15d   :  { %v637_v43 = vadd.f32 %v636_v19, %v600_v17 }
 0x15e   :  { %v633_v15 = vadd.f32 %v632_v28, %v596_v59 }
 0x15f   :  { %v1485_v35 = vmax.f32 %v637_v43, 0.0 }
 0x160   :  { %1345 = vmatmul.f32.gmra.mxu0 %v3136_v3  ;;  %v1518_v3 = vsel %vm356_vm0, %v49_v53, 0  ;;  %v1481_v46 = vmax.f32 %v633_v15, 0.0 }
 0x161   :  { %1383 = vmatmul.f32.gmra.mxu1 %v3108_v26  ;;  %v3414_v30 = vand.u32 4294901760, %v1518_v3 }
 0x162   :  { %1436 = vmatmul.f32.gmra.mxu2 %v3123_v63  ;;  %v3407_v61 = vpop.f32.mrf.mxu3  ;;  %v3442_v37 = vand.u32 4294901760, %v1481_v46 }
 0x163   :  { %v607_v44 = vpop.f32.mrf.mxu0  ;;  %1473 = vmatmul.f32.gmra.mxu3 %v3123_v63  ;;  %v3412_v54 = vpop.f32.mrf.mxu2  ;;  %v563_v63 = vadd.f32 %v562_v56, %v518_v57  ;;  %v3425_v22 = vsub.f32 %v1518_v3, %v3414_v30 }
 0x164   :  { %v640_v32 = vpop.f32.mrf.mxu1  ;;  %v1613_v31 = vsub.f32 %v1481_v46, %v3442_v37  ;;  %v690_v15 = vadd.f32 %v3412_v54, %v3385_v14 }
 0x165   :  { %v641_v26 = vadd.f32 %v640_v32, %v604_v38  ;;  %v608_v6 = vadd.f32 %v607_v44, %v563_v63  ;;  %v3438_v2 = vand.u32 4294901760, %v3425_v22  ;;  %v682_v38 = vadd.f32 %v3398_v50, %v3383_v13 }
 0x166   :  { %v1614_v9 = vand.u32 4294901760, %v1613_v31  ;;  %v1560_v44 = vsub.f32 %v3457_v25, %v3471_v18  ;;  %v674_v32 = vadd.f32 %v3381_v12, %v3389_v58  ;;  %v1527_v50 = vsel %vm356_vm0, %v52_v40, 0 }
 0x167   :  { %v1489_v60 = vmax.f32 %v641_v26, 0.0  ;;  %v1552_v28 = vsub.f32 %v3425_v22, %v3438_v2  ;;  %v743_v12 = vadd.f32 %v3395_v20, %v682_v38 }
 0x168   :  { %1350 = vmatmul.f32.gmra.mxu0 %v3163_v49  ;;  %v1615_v43 = vsub.f32 %v1613_v31, %v1614_v9  ;;  %v739_v21 = vadd.f32 %v3378_v34, %v674_v32 }
 0x169   :  { %1389 = vmatmul.f32.gmra.mxu1 %v3148_v48  ;;  %v3427_v55 = vand.u32 4294901760, %v1489_v60  ;;  %v3435_v48 = vand.u32 4294901760, %v1485_v35  ;;  %v3468_v45 = vand.u32 4294901760, %v1552_v28 }
 0x16a   :  { %1440 = vmatmul.f32.gmra.mxu2 %v3150_v0  ;;  %v3422_v7 = vpop.f32.mrf.mxu3  ;;  %v1616_v54 = vand.u32 4294901760, %v1615_v43 }
 0x16b   :  { %v3429_v49 = vpop.f32.mrf.mxu0  ;;  %1477 = vmatmul.f32.gmra.mxu3 %v3150_v0  ;;  %v3433_v16 = vpop.f32.mrf.mxu2  ;;  %v1601_v39 = vsub.f32 %v1489_v60, %v3427_v55  ;;  %v51_v0 = vld [vmem:[%s3846_s5 + $0x10] sm:$0xff]  ;;  %v1607_v51 = vsub.f32 %v1485_v35, %v3435_v48  ;;  %v3498_v35 = vand.u32 4294901760, %v1560_v44 }
 0x16c   :  { %v644_v1 = vpop.f32.mrf.mxu1 }
 0x16d   :  { %v645_v36 = vadd.f32 %v644_v1, %v608_v6  ;;  %v1602_v11 = vand.u32 4294901760, %v1601_v39  ;;  %v1608_v4 = vand.u32 4294901760, %v1607_v51  ;;  %v3503_v6 = vand.u32 4294901760, %v1527_v50 }
 0x16f   :  { %v1493_v56 = vmax.f32 %v645_v36, 0.0  ;;  %v1603_v23 = vsub.f32 %v1601_v39, %v1602_v11  ;;  %v1609_v17 = vsub.f32 %v1607_v51, %v1608_v4  ;;  %v747_v36 = vadd.f32 %v3407_v61, %v690_v15 }
 0x170   :  { %v3513_v34 = vsub.f32 %v1527_v50, %v3503_v6 }
 0x171   :  { %v3448_v27 = vand.u32 4294901760, %v1493_v56  ;;  %1395 = vmatmul.f32.gmra.mxu1 %v3188_v10  ;;  %v1524_v10 = vsel %vm356_vm0, %v51_v0, 0  ;;  %v1604_v57 = vand.u32 4294901760, %v1603_v23  ;;  %v1610_v63 = vand.u32 4294901760, %v1609_v17 }
 0x172   :  { %v3452_v8 = vpop.f32.mrf.mxu3  ;;  %v3473_v52 = vand.u32 4294901760, %v1524_v10 }
 0x173   :  { %v1595_v47 = vsub.f32 %v1493_v56, %v3448_v27  ;;  %1542 = vmatpush.msra.mxu0 %v3448_v27  ;;  %1693 = vmatpush.msra.mxu3 %v3448_v27  ;;  %v781_v56 = vadd.f32 %v3429_v49, %v739_v21  ;;  %v698_v49 = vadd.f32 %v3433_v16, %v3373_v62 }
 0x174   :  { %v785_v33 = vpop.f32.mrf.mxu0  ;;  %v3464_v41 = vpop.f32.mrf.mxu2  ;;  %v3488_v3 = vsub.f32 %v1524_v10, %v3473_v52 }
 0x175   :  { %v822_v42 = vpop.f32.mrf.mxu1  ;;  %1544 = vmatpush.msra.mxu0 %v3427_v55  ;;  %1649 = vmatpush.msra.mxu2 %v1595_v47  ;;  %v1596_v19 = vand.u32 4294901760, %v1595_v47  ;;  %v786_v1 = vadd.f32 %v785_v33, %v743_v12  ;;  %v751_v16 = vadd.f32 %v3422_v7, %v698_v49 }
 0x176   :  { %1695 = vmatpush.msra.mxu3 %v3427_v55  ;;  %v3501_v46 = vand.u32 4294901760, %v3488_v3 }
 0x177   :  { %1546 = vmatpush.msra.mxu0 %v3435_v48  ;;  %1652 = vmatpush.msra.mxu2 %v1601_v39  ;;  %v1597_v53 = vsub.f32 %v1595_v47, %v1596_v19 }
 0x178   :  { %1697 = vmatpush.msra.mxu3 %v3435_v48  ;;  %v1568_v39 = vsub.f32 %v3488_v3, %v3501_v46 }
 0x179   :  { %1548 = vmatpush.msra.mxu0 %v3442_v37  ;;  %1655 = vmatpush.msra.mxu2 %v1607_v51  ;;  %v1598_v24 = vand.u32 4294901760, %v1597_v53  ;;  %v823_v51 = vadd.f32 %v822_v42, %v781_v56 }
 0x17a   :  { %1699 = vmatpush.msra.mxu3 %v3442_v37  ;;  %1554 = vmatmul.f32.vlgmr.msra.gmra.mxu0 %v3468_v45  ;;  %v3521_v33 = vand.u32 4294901760, %v1568_v39 }
 0x17b   :  { %1740 = vmatpush.msrb.mxu0 %v1596_v19  ;;  %1599 = vmatpush.msra.mxu1 %v1598_v24  ;;  %v914_v59 = vpop.f32.mrf.mxu3  ;;  %v874_v42 = vadd.f32 %v3464_v41, %v823_v51 }
 0x17c   :  { %1658 = vmatpush.msra.mxu2 %v1613_v31  ;;  %v790_v26 = vpop.f32.mrf.mxu0  ;;  %1703 = vmatmul.f32.vlgmr.msra.gmra.mxu3 %v3438_v2 }
 0x17d   :  { %v828_v60 = vpop.f32.mrf.mxu1  ;;  %v877_v5 = vpop.f32.mrf.mxu2  ;;  %1744 = vmatpush.msrb.mxu0 %v1602_v11  ;;  %1605 = vmatpush.msra.mxu1 %v1604_v57  ;;  %v791_v61 = vadd.f32 %v790_v26, %v747_v36 }
 0x17e   :  { %1661 = vmatmul.f32.vlgmr.msra.gmra.mxu2 %v3425_v22  ;;  %v829_v20 = vadd.f32 %v828_v60, %v786_v1 }
 0x17f   :  { %1748 = vmatpush.msrb.mxu0 %v1608_v4  ;;  %1611 = vmatpush.msra.mxu1 %v1610_v63 }
 0x180   :  { %v878_v11 = vadd.f32 %v877_v5, %v829_v20 }
 0x181   :  { %1752 = vmatpush.msrb.mxu0 %v1614_v9  ;;  %1617 = vmatpush.msra.mxu1 %v1616_v54  ;;  %v911_v9 = vadd.f32 %v3452_v8, %v874_v42 }
 0x182   :  { %1562 = vmatmul.f32.gmra.mxu0 %v3498_v35  ;;  %1619 = vmatmul.f32.vlgmr.msra.gmra.mxu1 %v3414_v30  ;;  %v915_v4 = vadd.f32 %v914_v59, %v878_v11 }
 0x183   :  { %1783 = vmatpush.msrb.mxu1 %v3448_v27  ;;  %v918_v0 = vpop.f32.mrf.mxu3  ;;  %v3524_v27 = vand.u32 4294901760, %v3513_v34  ;;  %v1482_v44 = vmax.f32 %v911_v9, 0.0 }
 0x184   :  { %v795_v28 = vpop.f32.mrf.mxu0  ;;  %1709 = vmatmul.f32.gmra.mxu3 %v3471_v18  ;;  %v1486_v24 = vmax.f32 %v915_v4, 0.0 }
 0x185   :  { %v834_v47 = vpop.f32.mrf.mxu1  ;;  %v881_v31 = vpop.f32.mrf.mxu2  ;;  %1785 = vmatpush.msrb.mxu1 %v3427_v55  ;;  %v1576_v53 = vsub.f32 %v3513_v34, %v3524_v27  ;;  %v3547_v43 = vand.u32 4294901760, %v1482_v44 }
 0x186   :  { %v835_v10 = vadd.f32 %v834_v47, %v791_v61  ;;  %1666 = vmatmul.f32.gmra.mxu2 %v3457_v25  ;;  %v3543_v59 = vand.u32 4294901760, %v1486_v24 }
 0x187   :  { %1787 = vmatpush.msrb.mxu1 %v3435_v48  ;;  %v796_v48 = vadd.f32 %v795_v28, %v751_v16  ;;  %v3539_v38 = vand.u32 4294901760, %v1576_v53  ;;  %v1891_v1 = vsub.f32 %v1482_v44, %v3547_v43 }
 0x188   :  { %v882_v19 = vadd.f32 %v881_v31, %v835_v10  ;;  %v1885_v21 = vsub.f32 %v1486_v24, %v3543_v59 }
 0x189   :  { %1789 = vmatpush.msrb.mxu1 %v3442_v37  ;;  %v1892_v51 = vand.u32 4294901760, %v1891_v1 }
 0x18a   :  { %v919_v55 = vadd.f32 %v918_v0, %v882_v19  ;;  %1570 = vmatmul.f32.gmra.mxu0 %v3521_v33  ;;  %1623 = vmatmul.f32.gmra.mxu1 %v3440_v29  ;;  %v1886_v20 = vand.u32 4294901760, %v1885_v21 }
 0x18b   :  { %v922_v23 = vpop.f32.mrf.mxu3  ;;  %v1893_v42 = vsub.f32 %v1891_v1, %v1892_v51 }
 0x18c   :  { %v1490_v40 = vmax.f32 %v919_v55, 0.0  ;;  %v3535_v41 = vpop.f32.mrf.mxu0  ;;  %1715 = vmatmul.f32.gmra.mxu3 %v3501_v46  ;;  %v1887_v11 = vsub.f32 %v1885_v21, %v1886_v20 }
 0x18d   :  { %v840_v7 = vpop.f32.mrf.mxu1  ;;  %v885_v37 = vpop.f32.mrf.mxu2  ;;  %v1894_v16 = vand.u32 4294901760, %v1893_v42 }
 0x18e   :  { %v841_v17 = vadd.f32 %v840_v7, %v796_v48  ;;  %1671 = vmatmul.f32.gmra.mxu2 %v3488_v3  ;;  %v3541_v32 = vand.u32 4294901760, %v1490_v40  ;;  %v1888_v19 = vand.u32 4294901760, %v1887_v11 }
 0x190   :  { %v886_v57 = vadd.f32 %v885_v37, %v841_v17  ;;  %v1879_v15 = vsub.f32 %v1490_v40, %v3541_v32 }
 0x192   :  { %v923_v8 = vadd.f32 %v922_v23, %v886_v57  ;;  %1578 = vmatmul.f32.gmra.mxu0 %v3539_v38  ;;  %1627 = vmatmul.f32.gmra.mxu1 %v3473_v52  ;;  %v1880_v36 = vand.u32 4294901760, %v1879_v15 }
 0x193   :  { %v3549_v26 = vpop.f32.mrf.mxu3 }
 0x194   :  { %v1494_v50 = vmax.f32 %v923_v8, 0.0  ;;  %1721 = vmatmul.f32.gmra.mxu3 %v3524_v27  ;;  %v1881_v0 = vsub.f32 %v1879_v15, %v1880_v36  ;;  %v952_v8 = vadd.f32 %v3535_v41, %v3389_v58 }
 0x195   :  { %v3553_v60 = vpop.f32.mrf.mxu0  ;;  %v3555_v5 = vpop.f32.mrf.mxu2 }
 0x196   :  { %v1819_v63 = vand.u32 4294901760, %v1494_v50  ;;  %v3557_v12 = vpop.f32.mrf.mxu1  ;;  %1676 = vmatmul.f32.gmra.mxu2 %v3513_v34  ;;  %v1882_v10 = vand.u32 4294901760, %v1881_v0  ;;  %v960_v57 = vadd.f32 %v3553_v60, %v3383_v13 }
 0x198   :  { %v1873_v54 = vsub.f32 %v1494_v50, %v1819_v63  ;;  %1820 = vmatpush.msrb.mxu2 %v1819_v63  ;;  %1971 = vmatpush.msra.mxu1 %v1819_v63 }
 0x19a   :  { %1822 = vmatpush.msrb.mxu2 %v3541_v32  ;;  %1927 = vmatpush.msra.mxu0 %v1873_v54  ;;  %v1874_v56 = vand.u32 4294901760, %v1873_v54 }
 0x19b   :  { %1973 = vmatpush.msra.mxu1 %v3541_v32  ;;  %1754 = vmatmul.f32.vlgmr.msrb.gmra.mxu0 %v3414_v30 }
 0x19c   :  { %1631 = vmatmul.f32.gmra.mxu1 %v3503_v6  ;;  %1824 = vmatpush.msrb.mxu2 %v3543_v59  ;;  %v1875_v39 = vsub.f32 %v1873_v54, %v1874_v56 }
 0x19d   :  { %1930 = vmatpush.msra.mxu0 %v1879_v15  ;;  %1975 = vmatpush.msra.mxu1 %v3543_v59  ;;  %v967_v61 = vpop.f32.mrf.mxu0  ;;  %v3568_v28 = vpop.f32.mrf.mxu2 }
 0x19e   :  { %v1020_v49 = vpop.f32.mrf.mxu1  ;;  %1826 = vmatpush.msrb.mxu2 %v3547_v43  ;;  %v3571_v47 = vpop.f32.mrf.mxu3  ;;  %v1876_v31 = vand.u32 4294901760, %v1875_v39 }
 0x19f   :  { %1933 = vmatpush.msra.mxu0 %v1885_v21  ;;  %1977 = vmatpush.msra.mxu1 %v3547_v43 }
 0x1a0   :  { %1832 = vmatmul.f32.vlgmr.msrb.gmra.mxu2 %v3468_v45  ;;  %1877 = vmatpush.msrb.mxu3 %v1876_v31 }
 0x1a1   :  { %2018 = vmatpush.msra.mxu2 %v1874_v56  ;;  %1936 = vmatpush.msra.mxu0 %v1891_v1 }
 0x1a2   :  { %1883 = vmatpush.msrb.mxu3 %v1882_v10 }
 0x1a3   :  { %2022 = vmatpush.msra.mxu2 %v1880_v36  ;;  %1758 = vmatmul.f32.gmra.mxu0 %v3440_v29 }
 0x1a4   :  { %1791 = vmatmul.f32.vlgmr.msrb.gmra.mxu1 %v3414_v30  ;;  %1889 = vmatpush.msrb.mxu3 %v1888_v19 }
 0x1a5   :  { %2026 = vmatpush.msra.mxu2 %v1886_v20  ;;  %v975_v4 = vpop.f32.mrf.mxu0  ;;  %v1068_v55 = vpop.f32.mrf.mxu2 }
 0x1a6   :  { %v1024_v53 = vpop.f32.mrf.mxu1  ;;  %1895 = vmatpush.msrb.mxu3 %v1894_v16  ;;  %v1112_v23 = vpop.f32.mrf.mxu3  ;;  %v976_v41 = vadd.f32 %v975_v4, %v3373_v62 }
 0x1a7   :  { %2030 = vmatpush.msra.mxu2 %v1892_v51  ;;  %1897 = vmatmul.f32.vlgmr.msrb.gmra.mxu3 %v3414_v30 }
 0x1a8   :  { %1840 = vmatmul.f32.gmra.mxu2 %v3498_v35  ;;  %2061 = vmatpush.msra.mxu3 %v1819_v63  ;;  %v1017_v63 = vadd.f32 %v3557_v12, %v952_v8 }
 0x1aa   :  { %2063 = vmatpush.msra.mxu3 %v3541_v32  ;;  %v968_v32 = vadd.f32 %v967_v61, %v3385_v14  ;;  %v1059_v36 = vadd.f32 %v3555_v5, %v1017_v63 }
 0x1ab   :  { %1762 = vmatmul.f32.gmra.mxu0 %v3473_v52 }
 0x1ac   :  { %1795 = vmatmul.f32.gmra.mxu1 %v3440_v29  ;;  %2065 = vmatpush.msra.mxu3 %v3543_v59  ;;  %v1025_v59 = vadd.f32 %v1024_v53, %v968_v32  ;;  %v1101_v61 = vadd.f32 %v3549_v26, %v1059_v36 }
 0x1ad   :  { %v1073_v9 = vpop.f32.mrf.mxu2  ;;  %v1151_v48 = vpop.f32.mrf.mxu0 }
 0x1ae   :  { %v1028_v40 = vpop.f32.mrf.mxu1  ;;  %2067 = vmatpush.msra.mxu3 %v3547_v43  ;;  %v1118_v7 = vpop.f32.mrf.mxu3  ;;  %v1021_v43 = vadd.f32 %v1020_v49, %v960_v57  ;;  %v1069_v1 = vadd.f32 %v1068_v55, %v1025_v59  ;;  %v1152_v10 = vadd.f32 %v1151_v48, %v1101_v61 }
 0x1af   :  { %1901 = vmatmul.f32.gmra.mxu3 %v3440_v29  ;;  %v1029_v20 = vadd.f32 %v1028_v40, %v976_v41 }
 0x1b0   :  { %1848 = vmatmul.f32.gmra.mxu2 %v3521_v33  ;;  %v1064_v60 = vadd.f32 %v3568_v28, %v1021_v43  ;;  %v1113_v56 = vadd.f32 %v1112_v23, %v1069_v1 }
 0x1b1   :  { %v1074_v11 = vadd.f32 %v1073_v9, %v1029_v20 }
 0x1b2   :  { %v1107_v12 = vadd.f32 %v3571_v47, %v1064_v60 }
 0x1b3   :  { %1766 = vmatmul.f32.gmra.mxu0 %v3503_v6  ;;  %v1119_v16 = vadd.f32 %v1118_v7, %v1074_v11 }
 0x1b4   :  { %1799 = vmatmul.f32.gmra.mxu1 %v3473_v52 }
 0x1b5   :  { %v1155_v37 = vpop.f32.mrf.mxu0  ;;  %v3588_v24 = vpop.f32.mrf.mxu2 }
 0x1b6   :  { %v1188_v17 = vpop.f32.mrf.mxu1  ;;  %v3590_v44 = vpop.f32.mrf.mxu3  ;;  %v1156_v28 = vadd.f32 %v1155_v37, %v1107_v12  ;;  %v1230_v11 = vadd.f32 %v3588_v24, %v3389_v58 }
 0x1b7   :  { %1905 = vmatmul.f32.gmra.mxu3 %v3473_v52  ;;  %v1189_v47 = vadd.f32 %v1188_v17, %v1152_v10 }
 0x1b8   :  { %1856 = vmatmul.f32.gmra.mxu2 %v3539_v38  ;;  %v1295_v58 = vadd.f32 %v3590_v44, %v1230_v11 }
 0x1b9   :  { %v1483_v23 = vmax.f32 %v1189_v47, 0.0 }
 0x1bb   :  { %1939 = vmatmul.f32.vlgmr.msra.gmra.mxu0 %v3425_v22  ;;  %v3635_v32 = vand.u32 4294901760, %v1483_v23 }
 0x1bc   :  { %1803 = vmatmul.f32.gmra.mxu1 %v3503_v6 }
 0x1bd   :  { %v1159_v50 = vpop.f32.mrf.mxu0  ;;  %v3601_v15 = vpop.f32.mrf.mxu2  ;;  %v2169_v60 = vsub.f32 %v1483_v23, %v3635_v32 }
 0x1be   :  { %v1192_v21 = vpop.f32.mrf.mxu1  ;;  %v3604_v54 = vpop.f32.mrf.mxu3  ;;  %v1160_v39 = vadd.f32 %v1159_v50, %v1113_v56  ;;  %v1238_v61 = vadd.f32 %v3601_v15, %v3383_v13 }
 0x1bf   :  { %1909 = vmatmul.f32.gmra.mxu3 %v3503_v6  ;;  %v1193_v42 = vadd.f32 %v1192_v21, %v1156_v28 }
 0x1c0   :  { %2032 = vmatmul.f32.vlgmr.msra.gmra.mxu2 %v3414_v30  ;;  %v1299_v15 = vadd.f32 %v3604_v54, %v1238_v61 }
 0x1c1   :  { %v1487_v4 = vmax.f32 %v1193_v42, 0.0 }
 0x1c3   :  { %1944 = vmatmul.f32.gmra.mxu0 %v3457_v25  ;;  %v3632_v7 = vand.u32 4294901760, %v1487_v4 }
 0x1c4   :  { %1981 = vmatmul.f32.vlgmr.msra.gmra.mxu1 %v3438_v2 }
 0x1c5   :  { %v1163_v0 = vpop.f32.mrf.mxu0  ;;  %v3614_v51 = vpop.f32.mrf.mxu2  ;;  %v2163_v8 = vsub.f32 %v1487_v4, %v3632_v7 }
 0x1c6   :  { %v1196_v49 = vpop.f32.mrf.mxu1  ;;  %v3617_v31 = vpop.f32.mrf.mxu3  ;;  %v1164_v26 = vadd.f32 %v1163_v0, %v1119_v16  ;;  %v1246_v13 = vadd.f32 %v3614_v51, %v3385_v14 }
 0x1c7   :  { %v1197_v5 = vadd.f32 %v1196_v49, %v1160_v39  ;;  %2069 = vmatmul.f32.vlgmr.msra.gmra.mxu3 %v3414_v30  ;;  %v2164_v56 = vand.u32 4294901760, %v2163_v8  ;;  %v2170_v39 = vand.u32 4294901760, %v2169_v60 }
 0x1c8   :  { %2036 = vmatmul.f32.gmra.mxu2 %v3440_v29 }
 0x1c9   :  { %v1491_v19 = vmax.f32 %v1197_v5, 0.0  ;;  %v2165_v28 = vsub.f32 %v2163_v8, %v2164_v56  ;;  %v2171_v47 = vsub.f32 %v2169_v60, %v2170_v39 }
 0x1cb   :  { %1949 = vmatmul.f32.gmra.mxu0 %v3488_v3  ;;  %v3627_v9 = vand.u32 4294901760, %v1491_v19  ;;  %v2166_v16 = vand.u32 4294901760, %v2165_v28  ;;  %v2172_v4 = vand.u32 4294901760, %v2171_v47 }
 0x1cc   :  { %1987 = vmatmul.f32.gmra.mxu1 %v3471_v18 }
 0x1cd   :  { %v3623_v55 = vpop.f32.mrf.mxu2  ;;  %v3625_v53 = vpop.f32.mrf.mxu0  ;;  %v2157_v57 = vsub.f32 %v1491_v19, %v3627_v9 }
 0x1ce   :  { %v1200_v48 = vpop.f32.mrf.mxu1  ;;  %v3629_v40 = vpop.f32.mrf.mxu3  ;;  %v1337_v14 = vadd.f32 %v3625_v53, %v1295_v58 }
 0x1cf   :  { %v1201_v37 = vadd.f32 %v1200_v48, %v1164_v26  ;;  %2073 = vmatmul.f32.gmra.mxu3 %v3440_v29  ;;  %v2158_v41 = vand.u32 4294901760, %v2157_v57  ;;  %v1303_v26 = vadd.f32 %v3617_v31, %v1246_v13  ;;  %v3705_v13 = vpop.permute.xlu1 %1499 }
 0x1d0   :  { %2040 = vmatmul.f32.gmra.mxu2 %v3473_v52 }
 0x1d1   :  { %v1495_v17 = vmax.f32 %v1201_v37, 0.0  ;;  %v2159_v12 = vsub.f32 %v2157_v57, %v2158_v41 }
 0x1d3   :  { %v3638_v59 = vand.u32 4294901760, %v1495_v17  ;;  %1954 = vmatmul.f32.gmra.mxu0 %v3513_v34  ;;  %v2160_v10 = vand.u32 4294901760, %v2159_v12 }
 0x1d4   :  { %1993 = vmatmul.f32.gmra.mxu1 %v3501_v46 }
 0x1d5   :  { %v2151_v43 = vsub.f32 %v1495_v17, %v3638_v59  ;;  %2098 = vmatpush.msrb.mxu0 %v3638_v59  ;;  %2249 = vmatpush.msrb.mxu3 %v3638_v59  ;;  %v1341_v50 = vpop.f32.mrf.mxu0  ;;  %v3646_v63 = vpop.f32.mrf.mxu2  ;;  %v1254_v17 = vadd.f32 %v3623_v55, %v3373_v62 }
 0x1d6   :  { %v1378_v21 = vpop.f32.mrf.mxu1  ;;  %v3648_v1 = vpop.f32.mrf.mxu3  ;;  %v1342_v24 = vadd.f32 %v1341_v50, %v1299_v15 }
 0x1d7   :  { %2100 = vmatpush.msrb.mxu0 %v3627_v9  ;;  %2205 = vmatpush.msrb.mxu2 %v2151_v43  ;;  %v2152_v36 = vand.u32 4294901760, %v2151_v43  ;;  %v1379_v48 = vadd.f32 %v1378_v21, %v1337_v14 }
 0x1d8   :  { %2251 = vmatpush.msrb.mxu3 %v3627_v9  ;;  %2044 = vmatmul.f32.gmra.mxu2 %v3503_v6 }
 0x1d9   :  { %2077 = vmatmul.f32.gmra.mxu3 %v3473_v52  ;;  %2102 = vmatpush.msrb.mxu0 %v3632_v7  ;;  %v2153_v20 = vsub.f32 %v2151_v43, %v2152_v36 }
 0x1da   :  { %2208 = vmatpush.msrb.mxu2 %v2157_v57  ;;  %2253 = vmatpush.msrb.mxu3 %v3632_v7 }
 0x1db   :  { %2104 = vmatpush.msrb.mxu0 %v3635_v32  ;;  %v2154_v0 = vand.u32 4294901760, %v2153_v20 }
 0x1dc   :  { %2211 = vmatpush.msrb.mxu2 %v2163_v8  ;;  %2255 = vmatpush.msrb.mxu3 %v3635_v32  ;;  %v1430_v8 = vadd.f32 %v3646_v63, %v1379_v48 }
 0x1dd   :  { %1999 = vmatmul.f32.gmra.mxu1 %v3524_v27  ;;  %2110 = vmatmul.f32.vlgmr.msrb.gmra.mxu0 %v3468_v45  ;;  %v1433_v49 = vpop.f32.mrf.mxu2  ;;  %v1346_v19 = vpop.f32.mrf.mxu0 }
 0x1de   :  { %2296 = vmatpush.msra.mxu0 %v2152_v36  ;;  %2155 = vmatpush.msrb.mxu1 %v2154_v0  ;;  %v1384_v5 = vpop.f32.mrf.mxu1  ;;  %v1470_v42 = vpop.f32.mrf.mxu3  ;;  %v1347_v54 = vadd.f32 %v1346_v19, %v1303_v26  ;;  %v1467_v55 = vadd.f32 %v3648_v1, %v1430_v8 }
 0x1df   :  { %2214 = vmatpush.msrb.mxu2 %v2169_v60  ;;  %v1385_v51 = vadd.f32 %v1384_v5, %v1342_v24 }
 0x1e0   :  { %2300 = vmatpush.msra.mxu0 %v2158_v41  ;;  %2161 = vmatpush.msrb.mxu1 %v2160_v10 }
 0x1e1   :  { %2081 = vmatmul.f32.gmra.mxu3 %v3503_v6  ;;  %2217 = vmatmul.f32.vlgmr.msrb.gmra.mxu2 %v3425_v22  ;;  %v1434_v57 = vadd.f32 %v1433_v49, %v1385_v51 }
 0x1e2   :  { %2304 = vmatpush.msra.mxu0 %v2164_v56  ;;  %2167 = vmatpush.msrb.mxu1 %v2166_v16 }
 0x1e3   :  { %v1471_v21 = vadd.f32 %v1470_v42, %v1434_v57  ;;  %v3716_v57 = vpop.permute.xlu2 %1504 }
 0x1e4   :  { %2308 = vmatpush.msra.mxu0 %v2170_v39  ;;  %2173 = vmatpush.msrb.mxu1 %v2172_v4 }
 0x1e5   :  { %2118 = vmatmul.f32.gmra.mxu0 %v3498_v35  ;;  %2175 = vmatmul.f32.vlgmr.msrb.gmra.mxu1 %v3414_v30  ;;  %v1437_v23 = vpop.f32.mrf.mxu2  ;;  %v1351_v43 = vpop.f32.mrf.mxu0  ;;  %v1488_v36 = vmax.f32 %v1471_v21, 0.0 }
 0x1e6   :  { %2339 = vmatpush.msra.mxu1 %v3638_v59  ;;  %v1390_v44 = vpop.f32.mrf.mxu1  ;;  %v1474_v37 = vpop.f32.mrf.mxu3  ;;  %v1307_v59 = vadd.f32 %v3629_v40, %v1254_v17  ;;  %v1484_v40 = vmax.f32 %v1467_v55, 0.0 }
 0x1e7   :  { %v1391_v31 = vadd.f32 %v1390_v44, %v1347_v54  ;;  %v3692_v12 = vand.u32 4294901760, %v1488_v36 }
 0x1e8   :  { %2341 = vmatpush.msra.mxu1 %v3627_v9  ;;  %v1352_v62 = vadd.f32 %v1351_v43, %v1307_v59  ;;  %v3696_v1 = vand.u32 4294901760, %v1484_v40 }
 0x1e9   :  { %v1438_v53 = vadd.f32 %v1437_v23, %v1391_v31  ;;  %2222 = vmatmul.f32.gmra.mxu2 %v3457_v25  ;;  %2259 = vmatmul.f32.vlgmr.msrb.gmra.mxu3 %v3438_v2  ;;  %v2441_v49 = vsub.f32 %v1488_v36, %v3692_v12 }
 0x1ea   :  { %2343 = vmatpush.msra.mxu1 %v3632_v7  ;;  %v2447_v5 = vsub.f32 %v1484_v40, %v3696_v1 }
 0x1eb   :  { %v1475_v50 = vadd.f32 %v1474_v37, %v1438_v53  ;;  %v2442_v47 = vand.u32 4294901760, %v2441_v49 }
 0x1ec   :  { %2345 = vmatpush.msra.mxu1 %v3635_v32  ;;  %v2448_v58 = vand.u32 4294901760, %v2447_v5 }
 0x1ed   :  { %2126 = vmatmul.f32.gmra.mxu0 %v3521_v33  ;;  %2179 = vmatmul.f32.gmra.mxu1 %v3440_v29  ;;  %v1492_v9 = vmax.f32 %v1475_v50, 0.0  ;;  %v1441_v41 = vpop.f32.mrf.mxu2  ;;  %v2443_v54 = vsub.f32 %v2441_v49, %v2442_v47 }
 0x1ee   :  { %v1396_v60 = vpop.f32.mrf.mxu1  ;;  %v1478_v56 = vpop.f32.mrf.mxu3  ;;  %v2449_v37 = vsub.f32 %v2447_v5, %v2448_v58 }
 0x1ef   :  { %v1397_v63 = vadd.f32 %v1396_v60, %v1352_v62  ;;  %v3690_v32 = vand.u32 4294901760, %v1492_v9  ;;  %v2444_v31 = vand.u32 4294901760, %v2443_v54 }
 0x1f1   :  { %v1442_v7 = vadd.f32 %v1441_v41, %v1397_v63  ;;  %2227 = vmatmul.f32.gmra.mxu2 %v3488_v3  ;;  %2265 = vmatmul.f32.gmra.mxu3 %v3471_v18  ;;  %v2435_v0 = vsub.f32 %v1492_v9, %v3690_v32  ;;  %v3724_v9 = vpop.permute.xlu0 %1509 }
 0x1f3   :  { %v1479_v20 = vadd.f32 %v1478_v56, %v1442_v7  ;;  %v2436_v10 = vand.u32 4294901760, %v2435_v0 }
 0x1f5   :  { %v1496_v39 = vmax.f32 %v1479_v20, 0.0  ;;  %2134 = vmatmul.f32.gmra.mxu0 %v3539_v38  ;;  %2183 = vmatmul.f32.gmra.mxu1 %v3473_v52  ;;  %v2437_v16 = vsub.f32 %v2435_v0, %v2436_v10 }
 0x1f7   :  { %v2375_v61 = vand.u32 4294901760, %v1496_v39  ;;  %v1555_v28 = vpop.f32.mrf.mxu0  ;;  %v2438_v44 = vand.u32 4294901760, %v2437_v16 }
 0x1f8   :  { %v1556_v19 = vadd.f32 %v1555_v28, %v3705_v13 }
 0x1f9   :  { %v2429_v11 = vsub.f32 %v1496_v39, %v2375_v61  ;;  %2232 = vmatmul.f32.gmra.mxu2 %v3513_v34  ;;  %2271 = vmatmul.f32.gmra.mxu3 %v3501_v46 }
 0x1fa   :  { %2376 = vmatpush.msra.mxu2 %v2375_v61  ;;  %2527 = vmatpush.msrb.mxu1 %v2375_v61 }
 0x1fb   :  { %2483 = vmatpush.msrb.mxu0 %v2429_v11  ;;  %v2430_v42 = vand.u32 4294901760, %v2429_v11 }
 0x1fc   :  { %2378 = vmatpush.msra.mxu2 %v3690_v32  ;;  %2529 = vmatpush.msrb.mxu1 %v3690_v32 }
 0x1fd   :  { %2187 = vmatmul.f32.gmra.mxu1 %v3503_v6  ;;  %2310 = vmatmul.f32.vlgmr.msra.gmra.mxu0 %v3414_v30  ;;  %v2431_v15 = vsub.f32 %v2429_v11, %v2430_v42 }
 0x1fe   :  { %2380 = vmatpush.msra.mxu2 %v3692_v12  ;;  %2486 = vmatpush.msrb.mxu0 %v2435_v0 }
 0x1ff   :  { %2531 = vmatpush.msrb.mxu1 %v3692_v12  ;;  %v1563_v24 = vpop.f32.mrf.mxu0  ;;  %v1620_v4 = vpop.f32.mrf.mxu1  ;;  %v2432_v26 = vand.u32 4294901760, %v2431_v15 }
 0x200   :  { %2382 = vmatpush.msra.mxu2 %v3696_v1  ;;  %2489 = vmatpush.msrb.mxu0 %v2441_v49  ;;  %v1621_v14 = vadd.f32 %v1620_v4, %v1556_v19  ;;  %v1704_v51 = vpop.f32.mrf.mxu3  ;;  %v1564_v53 = vadd.f32 %v1563_v24, %v3716_v57  ;;  %v2791_v49 = vld [vmem:[%s3844_s0] sm:$0x77] }
 0x201   :  { %2533 = vmatpush.msrb.mxu1 %v3696_v1  ;;  %2277 = vmatmul.f32.gmra.mxu3 %v3524_v27  ;;  %v1662_v23 = vpop.f32.mrf.mxu2  ;;  %v64_v11 = vmul.f32 %v2791_v49, %v2791_v49 }
 0x202   :  { %2388 = vmatmul.f32.vlgmr.msra.gmra.mxu2 %v3468_v45  ;;  %2433 = vmatpush.msra.mxu3 %v2432_v26  ;;  %v1663_v48 = vadd.f32 %v1662_v23, %v1621_v14  ;;  %v2450_v45 = vand.u32 4294901760, %v2449_v37  ;;  %v3754_v37 = vpop.permute.xlu2 %2659 }
 0x203   :  { %2574 = vmatpush.msrb.mxu2 %v2430_v42  ;;  %2492 = vmatpush.msrb.mxu0 %v2447_v5  ;;  %v2771_v15 = vrot.slane %v64_v11, 9 }
 0x204   :  { %2439 = vmatpush.msra.mxu3 %v2438_v44  ;;  %v1705_v17 = vadd.f32 %v1704_v51, %v1663_v48 }
 0x205   :  { %2578 = vmatpush.msrb.mxu2 %v2436_v10  ;;  %2314 = vmatmul.f32.gmra.mxu0 %v3440_v29  ;;  %v74_v16 = vadd.f32 %v2771_v15, %v64_v11 }
 0x206   :  { %2347 = vmatmul.f32.vlgmr.msra.gmra.mxu1 %v3414_v30  ;;  %2445 = vmatpush.msra.mxu3 %v2444_v31 }
 0x207   :  { %2582 = vmatpush.msrb.mxu2 %v2442_v47  ;;  %v1571_v8 = vpop.f32.mrf.mxu0  ;;  %v1624_v43 = vpop.f32.mrf.mxu1 }
 0x208   :  { %2451 = vmatpush.msra.mxu3 %v2450_v45  ;;  %v1625_v59 = vadd.f32 %v1624_v43, %v1564_v53  ;;  %v1710_v50 = vpop.f32.mrf.mxu3  ;;  %v1572_v60 = vadd.f32 %v1571_v8, %v3724_v9 }
 0x209   :  { %2586 = vmatpush.msrb.mxu2 %v2448_v58  ;;  %2453 = vmatmul.f32.vlgmr.msra.gmra.mxu3 %v3414_v30  ;;  %v1667_v21 = vpop.f32.mrf.mxu2  ;;  %v2773_v58 = vrot.slane %v64_v11, 10 }
 0x20a   :  { %2396 = vmatmul.f32.gmra.mxu2 %v3498_v35  ;;  %2617 = vmatpush.msrb.mxu3 %v2375_v61  ;;  %v1668_v62 = vadd.f32 %v1667_v21, %v1625_v59 }
 0x20b   :  { %v3751_v14 = vadd.f32 %v2773_v58, %v74_v16 }
 0x20c   :  { %2619 = vmatpush.msrb.mxu3 %v3690_v32  ;;  %v1711_v55 = vadd.f32 %v1710_v50, %v1668_v62  ;;  %v3735_v32 = vpop.permute.xlu1 %1514 }
 0x20d   :  { %2318 = vmatmul.f32.gmra.mxu0 %v3473_v52  ;;  %2787 = vrcp.f32 %v3751_v14  ;;  %vm89_vm1 = vweird.f32 %v3751_v14 }
 0x20e   :  { %2351 = vmatmul.f32.gmra.mxu1 %v3440_v29  ;;  %2621 = vmatpush.msrb.mxu3 %v3692_v12 }
 0x20f   :  { %v1579_v41 = vpop.f32.mrf.mxu0  ;;  %v1628_v63 = vpop.f32.mrf.mxu1 }
 0x210   :  { %2623 = vmatpush.msrb.mxu3 %v3696_v1  ;;  %v1629_v35 = vadd.f32 %v1628_v63, %v1572_v60  ;;  %v1716_v56 = vpop.f32.mrf.mxu3  ;;  %v1580_v20 = vadd.f32 %v1579_v41, %v3735_v32 }
 0x211   :  { %2457 = vmatmul.f32.gmra.mxu3 %v3440_v29  ;;  %v1672_v36 = vpop.f32.mrf.mxu2 }
 0x212   :  { %2404 = vmatmul.f32.gmra.mxu2 %v3521_v33  ;;  %v1673_v7 = vadd.f32 %v1672_v36, %v1629_v35 }
 0x213   :  { %v2788_v50 = vpop.eup %2787 }
 0x214   :  { %v1717_v40 = vadd.f32 %v1716_v56, %v1673_v7  ;;  %v3766_v60 = vpop.permute.xlu1 %2669  ;;  %vm90_vm2 = vweird.f32 %v2788_v50 }
 0x215   :  { %2322 = vmatmul.f32.gmra.mxu0 %v3503_v6  ;;  %vm91_vm3 = vmor %vm89_vm1, %vm90_vm2 }
 0x216   :  { %2355 = vmatmul.f32.gmra.mxu1 %v3473_v52 }
 0x218   :  { %v1755_v12 = vpop.f32.mrf.mxu0  ;;  %v1722_v33 = vpop.f32.mrf.mxu3 }
 0x219   :  { %2461 = vmatmul.f32.gmra.mxu3 %v3473_v52  ;;  %v1632_v39 = vpop.f32.mrf.mxu1  ;;  %v1756_v1 = vadd.f32 %v1755_v12, %v1705_v17  ;;  %v1677_v0 = vpop.f32.mrf.mxu2 }
 0x21a   :  { %2412 = vmatmul.f32.gmra.mxu2 %v3539_v38  ;;  %v1633_v61 = vadd.f32 %v1632_v39, %v1580_v20 }
 0x21c   :  { %v1678_v28 = vadd.f32 %v1677_v0, %v1633_v61 }
 0x21d   :  { %2495 = vmatmul.f32.vlgmr.msrb.gmra.mxu0 %v3425_v22 }
 0x21e   :  { %2359 = vmatmul.f32.gmra.mxu1 %v3503_v6  ;;  %v1723_v5 = vadd.f32 %v1722_v33, %v1678_v28  ;;  %v95_v33 = vand.u32 2147483648, %v3751_v14 }
 0x220   :  { %v1759_v10 = vpop.f32.mrf.mxu0  ;;  %v96_v58 = vor.u32 1.1754944e-38, %v95_v33 }
 0x221   :  { %2465 = vmatmul.f32.gmra.mxu3 %v3503_v6  ;;  %v1760_v42 = vadd.f32 %v1759_v10, %v1711_v55  ;;  %v1792_v47 = vpop.f32.mrf.mxu1  ;;  %v93_v10 = vand.u32 2147483647, %v3751_v14 }
 0x222   :  { %2588 = vmatmul.f32.vlgmr.msrb.gmra.mxu2 %v3414_v30  ;;  %v1793_v38 = vadd.f32 %v1792_v47, %v1756_v1  ;;  %v3775_v1 = vpop.permute.xlu2 %2674 }
 0x223   :  { %v1833_v19 = vpop.f32.mrf.mxu2  ;;  %vm94_vm4 = vcmp.eq.f32.partialorder %v93_v10, 8.507059e+37 }
 0x224   :  { %v1834_v24 = vadd.f32 %v1833_v19, %v3705_v13  ;;  %v2641_v51 = vmax.f32 %v1793_v38, 0.0 }
 0x225   :  { %2500 = vmatmul.f32.gmra.mxu0 %v3457_v25 }
 0x226   :  { %2537 = vmatmul.f32.vlgmr.msrb.gmra.mxu1 %v3438_v2  ;;  %v3756_v2 = vpop.permute.xlu0 %2664 }
 0x228   :  { %v1763_v22 = vpop.f32.mrf.mxu0 }
 0x229   :  { %2625 = vmatmul.f32.vlgmr.msrb.gmra.mxu3 %v3414_v30  ;;  %v1764_v4 = vadd.f32 %v1763_v22, %v1717_v40  ;;  %v1796_v26 = vpop.f32.mrf.mxu1  ;;  %v2677_v30 = vmul.f32 %v3754_v37, %v2641_v51 }
 0x22a   :  { %2592 = vmatmul.f32.gmra.mxu2 %v3440_v29  ;;  %v1797_v54 = vadd.f32 %v1796_v26, %v1760_v42  ;;  %v1898_v23 = vpop.f32.mrf.mxu3 }
 0x22b   :  { %v1841_v48 = vpop.f32.mrf.mxu2  ;;  %v1899_v25 = vadd.f32 %v1898_v23, %v1834_v24 }
 0x22c   :  { %v2645_v44 = vmax.f32 %v1797_v54, 0.0  ;;  %v1842_v45 = vadd.f32 %v1841_v48, %v3716_v57 }
 0x22d   :  { %2505 = vmatmul.f32.gmra.mxu0 %v3488_v3 }
 0x22e   :  { %v2681_v17 = vmul.f32 %v3756_v2, %v2645_v44  ;;  %2543 = vmatmul.f32.gmra.mxu1 %v3471_v18 }
 0x230   :  { %v2693_v31 = vadd.f32 %v2681_v17, %v2677_v30  ;;  %v1767_v53 = vpop.f32.mrf.mxu0 }
 0x231   :  { %2629 = vmatmul.f32.gmra.mxu3 %v3440_v29  ;;  %v1768_v8 = vadd.f32 %v1767_v53, %v1723_v5  ;;  %v1800_v43 = vpop.f32.mrf.mxu1  ;;  %v85_v29 = vmul.f32 %v2788_v50, %v3751_v14 }
 0x232   :  { %2596 = vmatmul.f32.gmra.mxu2 %v3473_v52  ;;  %v1801_v59 = vadd.f32 %v1800_v43, %v1764_v4  ;;  %v1902_v3 = vpop.f32.mrf.mxu3 }
 0x233   :  { %v1849_v21 = vpop.f32.mrf.mxu2  ;;  %v1903_v62 = vadd.f32 %v1902_v3, %v1842_v45  ;;  %v86_v7 = vsub.f32 1.0, %v85_v29 }
 0x234   :  { %v2649_v55 = vmax.f32 %v1801_v59, 0.0  ;;  %v1850_v35 = vadd.f32 %v1849_v21, %v3724_v9 }
 0x235   :  { %2510 = vmatmul.f32.gmra.mxu0 %v3513_v34 }
 0x236   :  { %v2685_v18 = vmul.f32 %v3766_v60, %v2649_v55  ;;  %2549 = vmatmul.f32.gmra.mxu1 %v3501_v46  ;;  %v87_v46 = vmul.f32 %v2788_v50, %v86_v7 }
 0x238   :  { %v2694_v41 = vadd.f32 %v2693_v31, %v2685_v18  ;;  %v1940_v63 = vpop.f32.mrf.mxu0  ;;  %v88_v5 = vadd.f32 %v2788_v50, %v87_v46 }
 0x239   :  { %2633 = vmatmul.f32.gmra.mxu3 %v3473_v52  ;;  %v1804_v36 = vpop.f32.mrf.mxu1  ;;  %v1941_v56 = vadd.f32 %v1940_v63, %v1899_v25  ;;  %v3789_v25 = vstv %s3847_s8 }
 0x23a   :  { %2600 = vmatmul.f32.gmra.mxu2 %v3503_v6  ;;  %v1805_v40 = vadd.f32 %v1804_v36, %v1768_v8  ;;  %v1906_v20 = vpop.f32.mrf.mxu3  ;;  %v92_v22 = vsel %vm91_vm3, %v2788_v50, %v88_v5 }
 0x23b   :  { %v1857_v34 = vpop.f32.mrf.mxu2  ;;  %v1907_v12 = vadd.f32 %v1906_v20, %v1850_v35 }
 0x23c   :  { %v2653_v39 = vmax.f32 %v1805_v40, 0.0  ;;  %v1858_v28 = vadd.f32 %v1857_v34, %v3735_v32 }
 0x23e   :  { %v2689_v0 = vmul.f32 %v3775_v1, %v2653_v39  ;;  %2555 = vmatmul.f32.gmra.mxu1 %v3524_v27 }
 0x240   :  { %v2695_v52 = vadd.f32 %v2694_v41, %v2689_v0  ;;  %v1945_v61 = vpop.f32.mrf.mxu0 }
 0x241   :  { %2637 = vmatmul.f32.gmra.mxu3 %v3503_v6  ;;  %v1946_v49 = vadd.f32 %v1945_v61, %v1903_v62  ;;  %v1982_v11 = vpop.f32.mrf.mxu1  ;;  %v3784_v6 = vsel %vm94_vm4, %v96_v58, %v92_v22 }
 0x242   :  { %v2696_v42 = vrot.slane %v2695_v52, 4  ;;  %v1983_v47 = vadd.f32 %v1982_v11, %v1941_v56  ;;  %v1910_v15 = vpop.f32.mrf.mxu3  ;;  %v2736_v31 = vperm.slane %v3784_v6, 0 }
 0x243   :  { %v1911_v27 = vadd.f32 %v1910_v15, %v1858_v28  ;;  %v2033_v38 = vpop.f32.mrf.mxu2 }
 0x244   :  { %v2697_v19 = vadd.f32 %v2696_v42, %v2695_v52  ;;  %v2034_v16 = vadd.f32 %v2033_v38, %v1983_v47 }
 0x246   :  { %v2698_v24 = vrot.slane %v2697_v19, 2 }
 0x248   :  { %v2699_v4 = vadd.f32 %v2698_v24, %v2697_v19  ;;  %v1950_v26 = vpop.f32.mrf.mxu0 }
 0x249   :  { %v1951_v51 = vadd.f32 %v1950_v26, %v1907_v12  ;;  %v1988_v54 = vpop.f32.mrf.mxu1 }
 0x24a   :  { %v2700_v23 = vrot.slane %v2699_v4, 1  ;;  %v1989_v14 = vadd.f32 %v1988_v54, %v1946_v49  ;;  %v2070_v48 = vpop.f32.mrf.mxu3 }
 0x24b   :  { %v2037_v44 = vpop.f32.mrf.mxu2  ;;  %v2071_v30 = vadd.f32 %v2070_v48, %v2034_v16 }
 0x24c   :  { %v2701_v17 = vadd.f32 %v2700_v23, %v2699_v4  ;;  %v2038_v53 = vadd.f32 %v2037_v44, %v1989_v14 }
 0x24d   :  { %v2642_v62 = vmax.f32 %v2071_v30, 0.0 }
 0x24e   :  { %v2730_v45 = vadd.f32 %v3789_v25, %v2701_v17 }
 0x24f   :  { %v2678_v63 = vmul.f32 %v3754_v37, %v2642_v62 }
 0x250   :  { %v3793_v8 = vmul.f32 %v2736_v31, %v2730_v45  ;;  %v1955_v43 = vpop.f32.mrf.mxu0 }
 0x251   :  { %v1956_v59 = vadd.f32 %v1955_v43, %v1911_v27  ;;  %v1994_v3 = vpop.f32.mrf.mxu1 }
 0x252   :  { %v1995_v50 = vadd.f32 %v1994_v3, %v1951_v51  ;;  %v2074_v21 = vpop.f32.mrf.mxu3 }
 0x253   :  { %v2041_v55 = vpop.f32.mrf.mxu2  ;;  %v2075_v18 = vadd.f32 %v2074_v21, %v2038_v53 }
 0x254   :  { %v2042_v29 = vadd.f32 %v2041_v55, %v1995_v50  ;;  %v2737_v50 = vperm.slane %v3784_v6, 4 }
 0x255   :  { %v2646_v41 = vmax.f32 %v2075_v18, 0.0 }
 0x257   :  { %v2682_v35 = vmul.f32 %v3756_v2, %v2646_v41 }
 0x259   :  { %v2702_v36 = vadd.f32 %v2682_v35, %v2678_v63 }
 0x25a   :  { %v2000_v56 = vpop.f32.mrf.mxu1  ;;  %v2111_v7 = vpop.f32.mrf.mxu0 }
 0x25b   :  { %v2001_v40 = vadd.f32 %v2000_v56, %v1956_v59  ;;  %v2045_v20 = vpop.f32.mrf.mxu2  ;;  %v2112_v0 = vadd.f32 %v2111_v7, %v3705_v13 }
 0x25c   :  { %v2078_v34 = vpop.f32.mrf.mxu3 }
 0x25d   :  { %v2046_v12 = vadd.f32 %v2045_v20, %v2001_v40  ;;  %v2079_v39 = vadd.f32 %v2078_v34, %v2042_v29 }
 0x25f   :  { %v2650_v46 = vmax.f32 %v2079_v39, 0.0 }
 0x261   :  { %v2686_v52 = vmul.f32 %v3766_v60, %v2650_v46 }
 0x262   :  { %v2119_v61 = vpop.f32.mrf.mxu0  ;;  %v2176_v33 = vpop.f32.mrf.mxu1 }
 0x263   :  { %v2703_v28 = vadd.f32 %v2702_v36, %v2686_v52  ;;  %v2177_v49 = vadd.f32 %v2176_v33, %v2112_v0  ;;  %v2120_v15 = vadd.f32 %v2119_v61, %v3716_v57  ;;  %v2792_v36 = vld [vmem:[%s3844_s0 + $0x8] sm:$0x77] }
 0x264   :  { %v2082_v11 = vpop.f32.mrf.mxu3  ;;  %v2218_v5 = vpop.f32.mrf.mxu2  ;;  %v65_v56 = vmul.f32 %v2792_v36, %v2792_v36 }
 0x265   :  { %v2083_v10 = vadd.f32 %v2082_v11, %v2046_v12  ;;  %v2219_v42 = vadd.f32 %v2218_v5, %v2177_v49 }
 0x266   :  { %v2772_v20 = vrot.slane %v65_v56, 9  ;;  %v2774_v0 = vrot.slane %v65_v56, 10 }
 0x267   :  { %v2654_v47 = vmax.f32 %v2083_v10, 0.0 }
 0x268   :  { %v75_v46 = vadd.f32 %v2772_v20, %v65_v56 }
 0x269   :  { %v2690_v27 = vmul.f32 %v3775_v1, %v2654_v47 }
 0x26a   :  { %v2127_v38 = vpop.f32.mrf.mxu0  ;;  %v2180_v19 = vpop.f32.mrf.mxu1  ;;  %v83_v49 = vadd.f32 %v2774_v0, %v75_v46 }
 0x26b   :  { %v2704_v16 = vadd.f32 %v2703_v28, %v2690_v27  ;;  %v2181_v58 = vadd.f32 %v2180_v19, %v2120_v15  ;;  %v2128_v14 = vadd.f32 %v2127_v38, %v3724_v9 }
 0x26c   :  { %v2223_v22 = vpop.f32.mrf.mxu2  ;;  %v2260_v24 = vpop.f32.mrf.mxu3  ;;  %2789 = vrcp.f32 %v83_v49  ;;  %vm104_vm6 = vweird.f32 %v83_v49 }
 0x26d   :  { %v2705_v4 = vrot.slane %v2704_v16, 4  ;;  %v2224_v26 = vadd.f32 %v2223_v22, %v2181_v58  ;;  %v2261_v51 = vadd.f32 %v2260_v24, %v2219_v42 }
 0x26f   :  { %v2706_v54 = vadd.f32 %v2705_v4, %v2704_v16 }
 0x271   :  { %v2707_v23 = vrot.slane %v2706_v54, 2 }
 0x272   :  { %v2135_v48 = vpop.f32.mrf.mxu0  ;;  %v2184_v44 = vpop.f32.mrf.mxu1 }
 0x273   :  { %v2708_v30 = vadd.f32 %v2707_v23, %v2706_v54  ;;  %v2185_v17 = vadd.f32 %v2184_v44, %v2128_v14  ;;  %v2136_v47 = vadd.f32 %v2135_v48, %v3735_v32 }
 0x274   :  { %v2228_v31 = vpop.f32.mrf.mxu2  ;;  %v2266_v53 = vpop.f32.mrf.mxu3 }
 0x275   :  { %v2709_v45 = vrot.slane %v2708_v30, 1  ;;  %v2229_v43 = vadd.f32 %v2228_v31, %v2185_v17  ;;  %v2267_v59 = vadd.f32 %v2266_v53, %v2224_v26  ;;  %v2790_v26 = vpop.eup %2789 }
 0x276   :  { %vm105_vm7 = vweird.f32 %v2790_v26 }
 0x277   :  { %v2710_v3 = vadd.f32 %v2709_v45, %v2708_v30  ;;  %v100_v30 = vmul.f32 %v2790_v26, %v83_v49  ;;  %vm106_vm8 = vmor %vm104_vm6, %vm105_vm7 }
 0x279   :  { %v2731_v21 = vadd.f32 %v3789_v25, %v2710_v3  ;;  %v101_v53 = vsub.f32 1.0, %v100_v30 }
 0x27a   :  { %v2188_v62 = vpop.f32.mrf.mxu1  ;;  %v2311_v55 = vpop.f32.mrf.mxu0 }
 0x27b   :  { %v2745_v18 = vmul.f32 %v2737_v50, %v2731_v21  ;;  %v2312_v39 = vadd.f32 %v2311_v55, %v2261_v51  ;;  %v2189_v38 = vadd.f32 %v2188_v62, %v2136_v47  ;;  %v102_v21 = vmul.f32 %v2790_v26, %v101_v53 }
 0x27c   :  { %v2233_v29 = vpop.f32.mrf.mxu2  ;;  %v2272_v41 = vpop.f32.mrf.mxu3 }
 0x27d   :  { %v2752_v63 = vrot.slane %v2745_v18, 7  ;;  %v2273_v35 = vadd.f32 %v2272_v41, %v2229_v43  ;;  %v2234_v54 = vadd.f32 %v2233_v29, %v2189_v38  ;;  %v110_v18 = vand.u32 2147483648, %v83_v49 }
 0x27e   :  { %v103_v41 = vadd.f32 %v2790_v26, %v102_v21 }
 0x27f   :  { %v3808_v7 = vsel %vm2755_vm5, %v3793_v8, %v2752_v63  ;;  %v108_v63 = vand.u32 2147483647, %v83_v49  ;;  %v111_v20 = vor.u32 1.1754944e-38, %v110_v18 }
 0x281   :  { %vm109_vm9 = vcmp.eq.f32.partialorder %v108_v63, 8.507059e+37 }
 0x282   :  { %v2315_v40 = vpop.f32.mrf.mxu0 }
 0x283   :  { %v2348_v6 = vpop.f32.mrf.mxu1  ;;  %v2316_v61 = vadd.f32 %v2315_v40, %v2267_v59 }
 0x284   :  { %v2278_v34 = vpop.f32.mrf.mxu3  ;;  %v2349_v52 = vadd.f32 %v2348_v6, %v2312_v39 }
 0x285   :  { %v3810_v12 = vpop.f32.mrf.mxu2  ;;  %v2279_v14 = vadd.f32 %v2278_v34, %v2234_v54  ;;  %v107_v34 = vsel %vm106_vm8, %v2790_v26, %v103_v41 }
 0x286   :  { %v2643_v11 = vmax.f32 %v2349_v52, 0.0  ;;  %v3819_v0 = vsel %vm109_vm9, %v111_v20, %v107_v34 }
 0x287   :  { %v2738_v49 = vperm.slane %v3819_v0, 0 }
 0x288   :  { %v2679_v15 = vmul.f32 %v3754_v37, %v2643_v11 }
 0x28a   :  { %v2319_v33 = vpop.f32.mrf.mxu0 }
 0x28b   :  { %v2352_v28 = vpop.f32.mrf.mxu1  ;;  %v2320_v19 = vadd.f32 %v2319_v33, %v2273_v35 }
 0x28c   :  { %v2353_v5 = vadd.f32 %v2352_v28, %v2316_v61  ;;  %v3812_v10 = vpop.f32.mrf.mxu3 }
 0x28d   :  { %v2397_v8 = vpop.f32.mrf.mxu2 }
 0x28e   :  { %v2647_v42 = vmax.f32 %v2353_v5, 0.0  ;;  %v2398_v5 = vadd.f32 %v2397_v8, %v3716_v57 }
 0x290   :  { %v2683_v27 = vmul.f32 %v3756_v2, %v2647_v42 }
 0x292   :  { %v2711_v16 = vadd.f32 %v2683_v27, %v2679_v15  ;;  %v2323_v58 = vpop.f32.mrf.mxu0  ;;  %v2390_v15 = vadd.f32 %v3810_v12, %v3705_v13 }
 0x293   :  { %v2356_v22 = vpop.f32.mrf.mxu1  ;;  %v2324_v48 = vadd.f32 %v2323_v58, %v2279_v14 }
 0x294   :  { %v2357_v24 = vadd.f32 %v2356_v22, %v2320_v19  ;;  %v2458_v4 = vpop.f32.mrf.mxu3 }
 0x295   :  { %v2405_v51 = vpop.f32.mrf.mxu2  ;;  %v2459_v38 = vadd.f32 %v2458_v4, %v2398_v5 }
 0x296   :  { %v2651_v23 = vmax.f32 %v2357_v24, 0.0  ;;  %v2406_v27 = vadd.f32 %v2405_v51, %v3724_v9 }
 0x298   :  { %v2687_v44 = vmul.f32 %v3766_v60, %v2651_v23 }
 0x29a   :  { %v2712_v17 = vadd.f32 %v2711_v16, %v2687_v44  ;;  %v2496_v43 = vpop.f32.mrf.mxu0  ;;  %v2455_v16 = vadd.f32 %v3812_v10, %v2390_v15 }
 0x29b   :  { %v2360_v31 = vpop.f32.mrf.mxu1 }
 0x29c   :  { %v2361_v45 = vadd.f32 %v2360_v31, %v2324_v48  ;;  %v2462_v59 = vpop.f32.mrf.mxu3  ;;  %v2497_v54 = vadd.f32 %v2496_v43, %v2455_v16 }
 0x29d   :  { %v2413_v3 = vpop.f32.mrf.mxu2  ;;  %v2463_v58 = vadd.f32 %v2462_v59, %v2406_v27 }
 0x29e   :  { %v2655_v50 = vmax.f32 %v2361_v45, 0.0  ;;  %v2414_v30 = vadd.f32 %v2413_v3, %v3735_v32 }
 0x2a0   :  { %v2691_v62 = vmul.f32 %v3775_v1, %v2655_v50 }
 0x2a2   :  { %v2713_v55 = vadd.f32 %v2712_v17, %v2691_v62  ;;  %v2501_v6 = vpop.f32.mrf.mxu0 }
 0x2a3   :  { %v2538_v29 = vpop.f32.mrf.mxu1  ;;  %v2502_v22 = vadd.f32 %v2501_v6, %v2459_v38 }
 0x2a4   :  { %v2714_v35 = vrot.slane %v2713_v55, 4  ;;  %v2466_v36 = vpop.f32.mrf.mxu3  ;;  %v2539_v8 = vadd.f32 %v2538_v29, %v2497_v54 }
 0x2a5   :  { %v2589_v56 = vpop.f32.mrf.mxu2  ;;  %v2467_v12 = vadd.f32 %v2466_v36, %v2414_v30 }
 0x2a6   :  { %v2715_v40 = vadd.f32 %v2714_v35, %v2713_v55  ;;  %v2590_v9 = vadd.f32 %v2589_v56, %v2539_v8 }
 0x2a8   :  { %v2716_v39 = vrot.slane %v2715_v40, 2 }
 0x2aa   :  { %v2717_v46 = vadd.f32 %v2716_v39, %v2715_v40  ;;  %v2506_v47 = vpop.f32.mrf.mxu0 }
 0x2ab   :  { %v2544_v52 = vpop.f32.mrf.mxu1  ;;  %v2507_v23 = vadd.f32 %v2506_v47, %v2463_v58 }
 0x2ac   :  { %v2718_v61 = vrot.slane %v2717_v46, 1  ;;  %v2626_v33 = vpop.f32.mrf.mxu3  ;;  %v2545_v14 = vadd.f32 %v2544_v52, %v2502_v22 }
 0x2ad   :  { %v2593_v28 = vpop.f32.mrf.mxu2  ;;  %v2627_v31 = vadd.f32 %v2626_v33, %v2590_v9 }
 0x2ae   :  { %v2719_v11 = vadd.f32 %v2718_v61, %v2717_v46  ;;  %v2594_v48 = vadd.f32 %v2593_v28, %v2545_v14 }
 0x2af   :  { %v2644_v21 = vmax.f32 %v2627_v31, 0.0 }
 0x2b0   :  { %v2732_v42 = vadd.f32 %v3789_v25, %v2719_v11 }
 0x2b1   :  { %v2680_v3 = vmul.f32 %v3754_v37, %v2644_v21  ;;  %v2762_v37 = vlaneseq }
 0x2b2   :  { %v2746_v19 = vmul.f32 %v2738_v49, %v2732_v42  ;;  %v2511_v13 = vpop.f32.mrf.mxu0 }
 0x2b3   :  { %v2550_v24 = vpop.f32.mrf.mxu1  ;;  %v2512_v53 = vadd.f32 %v2511_v13, %v2467_v12  ;;  %vm2764_vm12 = vcmp.lt.s32.totalorder %v2762_v37, 512 }
 0x2b4   :  { %v2630_v26 = vpop.f32.mrf.mxu3  ;;  %v2551_v44 = vadd.f32 %v2550_v24, %v2507_v23 }
 0x2b5   :  { %v2597_v57 = vpop.f32.mrf.mxu2  ;;  %v2631_v51 = vadd.f32 %v2630_v26, %v2594_v48 }
 0x2b6   :  { %v2598_v4 = vadd.f32 %v2597_v57, %v2551_v44 }
 0x2b7   :  { %v2648_v59 = vmax.f32 %v2631_v51, 0.0 }
 0x2b9   :  { %v2684_v55 = vmul.f32 %v3756_v2, %v2648_v59  ;;  %v2739_v2 = vperm.slane %v3819_v0, 4 }
 0x2bb   :  { %v2556_v17 = vpop.f32.mrf.mxu1  ;;  %v2720_v63 = vadd.f32 %v2684_v55, %v2680_v3 }
 0x2bc   :  { %v2634_v10 = vpop.f32.mrf.mxu3  ;;  %v2557_v43 = vadd.f32 %v2556_v17, %v2512_v53 }
 0x2bd   :  { %v2635_v45 = vadd.f32 %v2634_v10, %v2598_v4  ;;  %v2601_v50 = vpop.f32.mrf.mxu2 }
 0x2be   :  { %v2602_v18 = vadd.f32 %v2601_v50, %v2557_v43 }
 0x2bf   :  { %v2652_v62 = vmax.f32 %v2635_v45, 0.0 }
 0x2c1   :  { %v2688_v29 = vmul.f32 %v3766_v60, %v2652_v62  ;;  %v2753_v60 = vrot.slane %v2746_v19, 6 }
 0x2c3   :  { %v2721_v36 = vadd.f32 %v2720_v63, %v2688_v29 }
 0x2c4   :  { %v2638_v32 = vpop.f32.mrf.mxu3 }
 0x2c5   :  { %v2639_v41 = vadd.f32 %v2638_v32, %v2602_v18 }
 0x2c7   :  { %v2656_v35 = vmax.f32 %v2639_v41, 0.0 }
 0x2c9   :  { %v2692_v56 = vmul.f32 %v3775_v1, %v2656_v35 }
 0x2cb   :  { %v2722_v40 = vadd.f32 %v2721_v36, %v2692_v56 }
 0x2cd   :  { %v2723_v6 = vrot.slane %v2722_v40, 4 }
 0x2cf   :  { %v2724_v20 = vadd.f32 %v2723_v6, %v2722_v40 }
 0x2d1   :  { %v2725_v34 = vrot.slane %v2724_v20, 2 }
 0x2d3   :  { %v2726_v39 = vadd.f32 %v2725_v34, %v2724_v20 }
 0x2d5   :  { %v2727_v46 = vrot.slane %v2726_v39, 1 }
 0x2d7   :  { %v2728_v52 = vadd.f32 %v2727_v46, %v2726_v39 }
 0x2d9   :  { %v2733_v61 = vadd.f32 %v3789_v25, %v2728_v52 }
 0x2db   :  { %v2747_v33 = vmul.f32 %v2739_v2, %v2733_v61 }
 0x2dd   :  { %v2754_v28 = vrot.slane %v2747_v33, 5 }
 0x2df   :  { %v2758_v11 = vsel %vm2757_vm10, %v2753_v60, %v2754_v28 }
 0x2e0   :  { %v2760_v1 = vsel %vm2759_vm11, %v3808_v7, %v2758_v11 }
 0x2e1   :  { %2766 = vst.msk [vmem:[%s3848_s9] sm:$0xf] %vm2764_vm12, %v2760_v1 }

</bundles_post_ra>
